<compile_context>
chip_gen: v7x
topology: tpu7x:2x2x1
jax: 0.10.0
libtpu: 0.0.40
codegen_flags: <defaults>
</compile_context>

<pallas_src>
import functools
import math

import jax
import jax.numpy as jnp
from jax.experimental import pallas as pl
from jax.experimental.pallas import tpu as pltpu


_TARGET_TILE_BYTES = 4 * 1024 * 1024   # per input tile (double-buffered in+out ~16 MiB)
_VMEM_LIMIT_BYTES = 48 * 1024 * 1024   # explicit scoped-VMEM limit; <= v7x physical 64 MiB
_SEG_COLS = 128                        # padded "row id" width -> lane-dense intermediates


def _pick_block_rows(num_rows, row_bytes, target_bytes=_TARGET_TILE_BYTES):
    """Row-tile size: multiple of 8, within the VMEM budget, >=2 grid steps if possible."""
    if num_rows <= 8:
        return num_rows                                    # one block == full dim (allowed)
    max_rows = max(8, (target_bytes // max(1, row_bytes)) // 8 * 8)
    # Cap so the grid has at least 2 steps -> both v7x TensorCores get work.
    half = ((num_rows + 1) // 2 + 7) // 8 * 8
    return max(8, min(max_rows, half))


# ----------------------------------------------------------------------------- plain path
def _biasfree_ln_kernel(x_ref, w_ref, o_ref, *, eps):
    # x_ref: (block_rows, C); w_ref: (1, C); o_ref: (block_rows, C)
    x = x_ref[...].astype(jnp.float32)
    inv_c = 1.0 / x.shape[-1]
    mean = jnp.sum(x, axis=-1, keepdims=True) * inv_c
    xc = x - mean                                           # centered second moment
    var = jnp.sum(xc * xc, axis=-1, keepdims=True) * inv_c
    inv = jax.lax.rsqrt(var + eps)                          # EUP rsqrt; mul instead of div
    w = w_ref[...].astype(jnp.float32)
    o_ref[...] = (x * inv * w).astype(o_ref.dtype)


# ---------------------------------------------------------------------------- packed path
def _split_dot(a, b_bf16):
    """f32 x {0,1} matmul on the MXU with f32-class accuracy via a bf16 hi/lo split."""
    hi = a.astype(jnp.bfloat16)
    lo = (a - hi.astype(jnp.float32)).astype(jnp.bfloat16)
    return (jnp.dot(hi, b_bf16, preferred_element_type=jnp.float32)
            + jnp.dot(lo, b_bf16, preferred_element_type=jnp.float32))


def _biasfree_ln_packed_kernel(x_ref, w_ref, s_ref, st_ref, o_ref, *, eps, inv_c):
    # x_ref: (block_rows, P*C)  -- P logical rows packed per lane-row (lane-dense).
    # w_ref: (1, P*C)           -- weight tiled P times.
    # s_ref: (P*C, 128) 0/1 segment->row matrix; st_ref: (128, P*C) its transpose.
    x = x_ref[...].astype(jnp.float32)
    w = w_ref[...].astype(jnp.float32)
    s = s_ref[...]
    st = st_ref[...]

    row_sum = _split_dot(x, s)                              # (bp, 128) segmented sums (MXU)
    mean = row_sum * inv_c
    mean_b = _split_dot(mean, st)                           # broadcast mean back per segment
    xc = x - mean_b                                         # centered second moment
    var = _split_dot(xc * xc, s) * inv_c                    # (bp, 128)
    inv = jax.lax.rsqrt(var + eps)                          # garbage in cols >= P is zeroed
    inv_b = _split_dot(inv, st)                             #   out by the zero rows of S^T
    o_ref[...] = (x * inv_b * w).astype(o_ref.dtype)        # note: x, NOT xc (bias-free LN)


# -------------------------------------------------------------------------------- wrapper
def biasfree_layer_norm(x, weight, eps=1e-5):
    """Pallas BiasFree_LayerNorm over the last dim of `x`; `weight` has shape (C,)."""
    orig_shape = x.shape
    C = orig_shape[-1]
    R = 1
    for d in orig_shape[:-1]:
        R *= d
    itemsize = jnp.dtype(x.dtype).itemsize

    compiler_params = pltpu.CompilerParams(
        dimension_semantics=("parallel",),
        vmem_limit_bytes=_VMEM_LIMIT_BYTES,
    )

    # Lane-packing factor: smallest P with (P*C) % 128 == 0 (P always divides 128).
    pack = 1
    if C % 128 != 0:
        pack = math.lcm(C, 128) // C
        if R % pack != 0 or pack * C > 16384:
            pack = 1                                        # fall back to the plain kernel

    if pack > 1:
        P, PC = pack, pack * C
        Rp = R // pack
        xp = x.reshape(Rp, PC)                              # free view (row-major contiguous)
        wp = jnp.tile(weight.reshape(-1), P).reshape(1, PC)
        seg = jnp.arange(PC, dtype=jnp.int32) // C          # segment id in [0, P)
        cols = jnp.arange(_SEG_COLS, dtype=jnp.int32)
        s = (seg[:, None] == cols[None, :]).astype(jnp.bfloat16)   # (PC, 128), exact 0/1
        st = jnp.transpose(s)                                        # (128, PC)

        block_rows = _pick_block_rows(Rp, PC * itemsize)
        grid = (pl.cdiv(Rp, block_rows),)
        out = pl.pallas_call(
            functools.partial(_biasfree_ln_packed_kernel, eps=eps, inv_c=1.0 / C),
            out_shape=jax.ShapeDtypeStruct((Rp, PC), x.dtype),
            grid_spec=pltpu.PrefetchScalarGridSpec(
                num_scalar_prefetch=0,
                grid=grid,
                in_specs=[
                    pl.BlockSpec((block_rows, PC), lambda r: (r, 0)),
                    pl.BlockSpec((1, PC), lambda r: (0, 0)),          # weight resident
                    pl.BlockSpec((PC, _SEG_COLS), lambda r: (0, 0)),  # S resident
                    pl.BlockSpec((_SEG_COLS, PC), lambda r: (0, 0)),  # S^T resident
                ],
                out_specs=pl.BlockSpec((block_rows, PC), lambda r: (r, 0)),
            ),
            compiler_params=compiler_params,
        )(xp, wp, s, st)
        return out.reshape(orig_shape)

    # Plain path: C already a multiple of 128 (lane-dense), or packing not applicable.
    x2 = x.reshape(R, C)
    w2 = weight.reshape(1, C)
    block_rows = _pick_block_rows(R, C * itemsize)
    grid = (pl.cdiv(R, block_rows),)
    out = pl.pallas_call(
        functools.partial(_biasfree_ln_kernel, eps=eps),
        out_shape=jax.ShapeDtypeStruct((R, C), x.dtype),
        grid_spec=pltpu.PrefetchScalarGridSpec(
            num_scalar_prefetch=0,
            grid=grid,
            in_specs=[
                pl.BlockSpec((block_rows, C), lambda r: (r, 0)),
                pl.BlockSpec((1, C), lambda r: (0, 0)),               # weight resident
            ],
            out_specs=pl.BlockSpec((block_rows, C), lambda r: (r, 0)),
        ),
        compiler_params=compiler_params,
    )(x2, w2)
    return out.reshape(orig_shape)


# ------------------------------------------------------------------------------ reference
def _reference(x, weight, eps=1e-5):
    sigma = jnp.var(x.astype(jnp.float32), axis=-1, keepdims=True)   # ddof=0 (unbiased=False)
    return (x.astype(jnp.float32) / jnp.sqrt(sigma + eps) * weight).astype(x.dtype)


if __name__ == "__main__":
    key = jax.random.PRNGKey(0)
    k1, k2, k3, kw = jax.random.split(key, 4)

    # Restormer-style normed tensor: (B, H*W, C) with C = normalized_shape = 48.
    C = 48
    weight = jnp.ones((C,), jnp.float32) + 0.1 * jax.random.normal(kw, (C,), jnp.float32)

    # Case 1: R = 512 divisible by P = 8 -> lane-packed MXU path.
    x1 = jax.random.normal(k1, (2, 16 * 16, C), dtype=jnp.float32)
    o1 = jax.block_until_ready(biasfree_layer_norm(x1, weight, eps=1e-5))
    r1 = _reference(x1, weight, eps=1e-5)
    assert o1.shape == x1.shape
    assert jnp.allclose(o1, r1, atol=1e-4, rtol=1e-4), "mismatch vs reference (packed path)"

    # Case 2: C multiple of 128 -> already lane-dense plain path.
    C2 = 128
    w2 = jnp.ones((C2,), jnp.float32) + 0.1 * jax.random.normal(kw, (C2,), jnp.float32)
    x2 = jax.random.normal(k2, (2, 64, C2), dtype=jnp.float32)
    o2 = jax.block_until_ready(biasfree_layer_norm(x2, w2, eps=1e-5))
    assert jnp.allclose(o2, _reference(x2, w2, eps=1e-5), atol=1e-5, rtol=1e-5), \
        "mismatch vs reference (plain dense path)"

    # Case 3: rows not divisible by the packing factor -> fallback path + ragged grid.
    x3 = jax.random.normal(k3, (3, 25, C), dtype=jnp.float32)
    o3 = jax.block_until_ready(biasfree_layer_norm(x3, weight, eps=1e-5))
    assert jnp.allclose(o3, _reference(x3, weight, eps=1e-5), atol=1e-5, rtol=1e-5), \
        "mismatch vs reference (fallback path)"

    print("KERNEL_OK")
</pallas_src>

<mosaic_0001>
module attributes {stable_mosaic.version = 11 : i64} {
  func.func @_biasfree_ln_packed_kernel(%arg0: i32, %arg1: memref<32x384xf32, #tpu.memory_space<vmem>>, %arg2: memref<1x384xf32, #tpu.memory_space<vmem>>, %arg3: memref<384x128xbf16, #tpu.memory_space<vmem>>, %arg4: memref<128x384xbf16, #tpu.memory_space<vmem>>, %arg5: memref<32x384xf32, #tpu.memory_space<vmem>>) attributes {dimension_semantics = [#tpu.dimension_semantics<parallel>], iteration_bounds = array<i64: 2>, scalar_prefetch = 0 : i64, scratch_operands = 0 : i64, tpu.core_type = #tpu.core_type<tc>, window_params = [{transform_indices = @transform_0, window_bounds = array<i64: 32, 384>}, {pipeline_mode = #tpu.pipeline_mode<synchronous>, transform_indices = @transform_1, window_bounds = array<i64: 1, 384>}, {pipeline_mode = #tpu.pipeline_mode<synchronous>, transform_indices = @transform_2, window_bounds = array<i64: 384, 128>}, {pipeline_mode = #tpu.pipeline_mode<synchronous>, transform_indices = @transform_3, window_bounds = array<i64: 128, 384>}, {transform_indices = @transform_4, window_bounds = array<i64: 32, 384>}]} {
    %c0 = arith.constant 0 : index
    %c0_0 = arith.constant 0 : index
    %0 = vector.load %arg1[%c0, %c0_0] : memref<32x384xf32, #tpu.memory_space<vmem>>, vector<32x384xf32>
    %c0_1 = arith.constant 0 : index
    %c0_2 = arith.constant 0 : index
    %1 = vector.load %arg2[%c0_1, %c0_2] : memref<1x384xf32, #tpu.memory_space<vmem>>, vector<1x384xf32>
    %c0_3 = arith.constant 0 : index
    %c0_4 = arith.constant 0 : index
    %2 = vector.load %arg3[%c0_3, %c0_4] : memref<384x128xbf16, #tpu.memory_space<vmem>>, vector<384x128xbf16>
    %c0_5 = arith.constant 0 : index
    %c0_6 = arith.constant 0 : index
    %3 = vector.load %arg4[%c0_5, %c0_6] : memref<128x384xbf16, #tpu.memory_space<vmem>>, vector<128x384xbf16>
    %4 = arith.truncf %0 : vector<32x384xf32> to vector<32x384xbf16>
    %5 = arith.extf %4 : vector<32x384xbf16> to vector<32x384xf32>
    %6 = arith.subf %0, %5 : vector<32x384xf32>
    %7 = arith.truncf %6 : vector<32x384xf32> to vector<32x384xbf16>
    %cst = arith.constant dense<0.000000e+00> : vector<32x128xf32>
    %8 = tpu.matmul %4, %2, %cst {dimension_numbers = #tpu.dot_dimension_numbers<[1], [0], [0], [1], [0, 0, 1, 1], [], []>} : vector<32x384xbf16>, vector<384x128xbf16>, vector<32x128xf32> -> vector<32x128xf32>
    %cst_7 = arith.constant dense<0.000000e+00> : vector<32x128xf32>
    %9 = tpu.matmul %7, %2, %cst_7 {dimension_numbers = #tpu.dot_dimension_numbers<[1], [0], [0], [1], [0, 0, 1, 1], [], []>} : vector<32x384xbf16>, vector<384x128xbf16>, vector<32x128xf32> -> vector<32x128xf32>
    %10 = arith.addf %8, %9 : vector<32x128xf32>
    %cst_8 = arith.constant 0.020833334 : f32
    %11 = vector.broadcast %cst_8 : f32 to vector<32x128xf32>
    %12 = arith.mulf %10, %11 : vector<32x128xf32>
    %13 = arith.truncf %12 : vector<32x128xf32> to vector<32x128xbf16>
    %14 = arith.extf %13 : vector<32x128xbf16> to vector<32x128xf32>
    %15 = arith.subf %12, %14 : vector<32x128xf32>
    %16 = arith.truncf %15 : vector<32x128xf32> to vector<32x128xbf16>
    %cst_9 = arith.constant dense<0.000000e+00> : vector<32x384xf32>
    %17 = tpu.matmul %13, %3, %cst_9 {dimension_numbers = #tpu.dot_dimension_numbers<[1], [0], [0], [1], [0, 0, 1, 1], [], []>} : vector<32x128xbf16>, vector<128x384xbf16>, vector<32x384xf32> -> vector<32x384xf32>
    %cst_10 = arith.constant dense<0.000000e+00> : vector<32x384xf32>
    %18 = tpu.matmul %16, %3, %cst_10 {dimension_numbers = #tpu.dot_dimension_numbers<[1], [0], [0], [1], [0, 0, 1, 1], [], []>} : vector<32x128xbf16>, vector<128x384xbf16>, vector<32x384xf32> -> vector<32x384xf32>
    %19 = arith.addf %17, %18 : vector<32x384xf32>
    %20 = arith.subf %0, %19 : vector<32x384xf32>
    %21 = arith.mulf %20, %20 : vector<32x384xf32>
    %22 = arith.truncf %21 : vector<32x384xf32> to vector<32x384xbf16>
    %23 = arith.extf %22 : vector<32x384xbf16> to vector<32x384xf32>
    %24 = arith.subf %21, %23 : vector<32x384xf32>
    %25 = arith.truncf %24 : vector<32x384xf32> to vector<32x384xbf16>
    %cst_11 = arith.constant dense<0.000000e+00> : vector<32x128xf32>
    %26 = tpu.matmul %22, %2, %cst_11 {dimension_numbers = #tpu.dot_dimension_numbers<[1], [0], [0], [1], [0, 0, 1, 1], [], []>} : vector<32x384xbf16>, vector<384x128xbf16>, vector<32x128xf32> -> vector<32x128xf32>
    %cst_12 = arith.constant dense<0.000000e+00> : vector<32x128xf32>
    %27 = tpu.matmul %25, %2, %cst_12 {dimension_numbers = #tpu.dot_dimension_numbers<[1], [0], [0], [1], [0, 0, 1, 1], [], []>} : vector<32x384xbf16>, vector<384x128xbf16>, vector<32x128xf32> -> vector<32x128xf32>
    %28 = arith.addf %26, %27 : vector<32x128xf32>
    %cst_13 = arith.constant 0.020833334 : f32
    %29 = vector.broadcast %cst_13 : f32 to vector<32x128xf32>
    %30 = arith.mulf %28, %29 : vector<32x128xf32>
    %cst_14 = arith.constant 9.99999974E-6 : f32
    %31 = vector.broadcast %cst_14 : f32 to vector<32x128xf32>
    %32 = arith.addf %30, %31 : vector<32x128xf32>
    %33 = math.rsqrt %32 : vector<32x128xf32>
    %34 = arith.truncf %33 : vector<32x128xf32> to vector<32x128xbf16>
    %35 = arith.extf %34 : vector<32x128xbf16> to vector<32x128xf32>
    %36 = arith.subf %33, %35 : vector<32x128xf32>
    %37 = arith.truncf %36 : vector<32x128xf32> to vector<32x128xbf16>
    %cst_15 = arith.constant dense<0.000000e+00> : vector<32x384xf32>
    %38 = tpu.matmul %34, %3, %cst_15 {dimension_numbers = #tpu.dot_dimension_numbers<[1], [0], [0], [1], [0, 0, 1, 1], [], []>} : vector<32x128xbf16>, vector<128x384xbf16>, vector<32x384xf32> -> vector<32x384xf32>
    %cst_16 = arith.constant dense<0.000000e+00> : vector<32x384xf32>
    %39 = tpu.matmul %37, %3, %cst_16 {dimension_numbers = #tpu.dot_dimension_numbers<[1], [0], [0], [1], [0, 0, 1, 1], [], []>} : vector<32x128xbf16>, vector<128x384xbf16>, vector<32x384xf32> -> vector<32x384xf32>
    %40 = arith.addf %38, %39 : vector<32x384xf32>
    %41 = arith.mulf %0, %40 : vector<32x384xf32>
    %42 = vector.broadcast %1 : vector<1x384xf32> to vector<32x384xf32>
    %43 = arith.mulf %41, %42 : vector<32x384xf32>
    %c0_17 = arith.constant 0 : index
    %c0_18 = arith.constant 0 : index
    %44 = vector.load %arg5[%c0_17, %c0_18] : memref<32x384xf32, #tpu.memory_space<vmem>>, vector<32x384xf32>
    tpu.vector_store %arg5[%c0_17, %c0_18], %43 {strides = array<i32>} : memref<32x384xf32, #tpu.memory_space<vmem>>, vector<32x384xf32>,
    return
  }
  func.func @transform_0(%arg0: i32) -> (i32, i32) {
    %c0_i32 = arith.constant 0 : i32
    %c0_i32_0 = arith.constant 0 : i32
    return %arg0, %c0_i32 : i32, i32
  }
  func.func @transform_1(%arg0: i32) -> (i32, i32) {
    %c0_i32 = arith.constant 0 : i32
    %c0_i32_0 = arith.constant 0 : i32
    %c0_i32_1 = arith.constant 0 : i32
    return %c0_i32, %c0_i32_0 : i32, i32
  }
  func.func @transform_2(%arg0: i32) -> (i32, i32) {
    %c0_i32 = arith.constant 0 : i32
    %c0_i32_0 = arith.constant 0 : i32
    %c0_i32_1 = arith.constant 0 : i32
    return %c0_i32, %c0_i32_0 : i32, i32
  }
  func.func @transform_3(%arg0: i32) -> (i32, i32) {
    %c0_i32 = arith.constant 0 : i32
    %c0_i32_0 = arith.constant 0 : i32
    %c0_i32_1 = arith.constant 0 : i32
    return %c0_i32, %c0_i32_0 : i32, i32
  }
  func.func @transform_4(%arg0: i32) -> (i32, i32) {
    %c0_i32 = arith.constant 0 : i32
    %c0_i32_0 = arith.constant 0 : i32
    return %arg0, %c0_i32 : i32, i32
  }
}

</mosaic_0001>

<bundles_post_ra>
// kernel: tpu_custom_call.1
= control target key start
LH: loop header
LB: loop body
LE: loop exit
PB: predicated region body
PF: predicated region fallthrough
CT: control target
= control target key end

     0   :  { %9 = vsyncpa [#allocation3], 0  ;;  %s3268_s0 = inlined_call_operand.hbm [shape: f32[64,384], index: 0, kind: input, shape index: {}]   ;;  %s3269_s1 = inlined_call_operand.vmem [shape: f32[1,384], index: 1, kind: input, shape index: {}]   ;;  %s3270_s2 = inlined_call_operand.hbm [shape: bf16[384,128], index: 2, kind: input, shape index: {}]   ;;  %s3271_s3 = inlined_call_operand.hbm [shape: bf16[128,384], index: 3, kind: input, shape index: {}]   ;;  %s3272_s4 = inlined_call_operand.hbm [shape: f32[64,384], index: 4, kind: output, shape index: {}]  }
   0x1   :  { %11 = vsyncpa [#allocation3 + $0x1], 0 }
   0x2   :  { %12 = vsyncpa [#allocation6], 0 }
   0x3   :  { %13 = vsyncpa [#allocation4], 0 }
   0x4   :  { %15 = vsyncpa [#allocation4 + $0x1], 0  ;;  %s2525_s15 = smov 0   ;;  %s2527_s16 = smov 0  }
   0x5   :  { %s2529_s17 = smov 0   ;;  %s2531_s18 = smov 0  }
   0x6 LB: > { %s2546_s19 = sadd.s32 4294967295, %s2485_s18   ;;  %s1709_s20 = sadd.s32 4294967294, %s2485_s18   ;;  %s2485_s18 = sphi %s2531_s18, %s3465_s18   ;;  %s2481_s17 = sphi %s2529_s17, %s3464_s17   ;;  %s2477_s16 = sphi %s2527_s16, %s3463_s16   ;;  %s2473_s15 = sphi %s2525_s15, %s3462_s15  }
   0x7   : > { %p41_p0 = scmp.ne.s32.totalorder %s2477_s16, %s2473_s15  ;;  %p3273_p1 = scmp.eq.s32.totalorder %s2546_s19, 0 }
   0x8   : > { %p134_p3 = scmp.eq.s32.totalorder %s1709_s20, 1  ;;  %p1710_p5 = scmp.ge.s32.totalorder %s2485_s18, 1 }
   0x9   : > { %p2555_p4 = por %p3273_p1, %p41_p0  ;;  %p141_p7 = scmp.lt.s32.totalorder %s2485_s18, 3 }
   0xa   : > { %p2560_p6 = por %p134_p3, %p41_p0  ;;  %s2487_s24 = smov [#allocation5]  }
   0xb   : > { %s3357_s21 = scalar_select %p2555_p4, 1, 0 }
   0xc   : > { %s3358_s22 = scalar_select %p2560_p6, 1, 0 }
   0xd   : > { %p2565_p8 = pnand %p1710_p5, %p141_p7  ;;  %s156_s25 = sshll.u32 %s2487_s24, 4  ;;  %s2569_s25 = int_to_ptr.vmem [resolvable:$true] %s156_s25 }
   0xe   : > { %s2488_s27 = smov [#allocation7]   ;;  %s2329_s5 = scalar_lea.hbm %s3270_s2, 3072 }
   0xf   : > { %p2189_p9 = pneg %p2565_p8  ;;  %s169_s28 = sshll.u32 %s2488_s27, 4  ;;  %s2580_s28 = int_to_ptr.vmem [resolvable:$true] %s169_s28 }
  0x10   : > { %p2330_p12 = scmp.ne.s32.totalorder %s3270_s2, %s2329_s5  ;;  %p2336_p5 = scmp.lt.u32.totalorder %s2329_s5, %s3270_s2 }
  0x11   : > { %p2576_p11 = pnand %p2189_p9, %p3273_p1 }
  0x13   : > { %p2331_p13 = pneg %p2576_p11 }
  0x15   : > { %p2332_p0 = pnand %p2331_p13, %p2330_p12 }
  0x17   : > { %p2333_p3 = pneg %p2332_p0 }
  0x19   : > { %p2338_p7 = pnand %p2336_p5, %p2333_p3 }
  0x1b   : > { %2341 = shalt.err (!%p2338_p7)
}
  0x1c   : > { %s2342_s10 = scalar_lea.vmem %s2569_s25, 3072  ;;  %p2350_p2 = scmp.lt.s32.totalorder %s2569_s25, %s2569_s25 }
  0x1d   : > { %p2343_p9 = scmp.ne.s32.totalorder %s2569_s25, %s2342_s10  ;;  %p2351_p12 = scmp.lt.s32.totalorder %s2342_s10, %s2342_s10 }
  0x1f   : > { %p2345_p10 = pnand %p2343_p9, %p2331_p13  ;;  %p2352_p0 = por %p2351_p12, %p2350_p2 }
  0x21   : > { %p2346_p1 = pneg %p2345_p10 }
  0x23   : > { %p2353_p6 = pnand %p2352_p0, %p2346_p1 }
  0x25   : > { %2356 = shalt.err (!%p2353_p6)
}
  0x26   : > { %s2489_s11 = smov 64   ;;  %s2490_s12 = smov 4  }
  0x27   : > { %2192 = dma.hbm_to_vmem [thread:$0]  (!%p2576_p11), %s3270_s2, 3072, %s2569_s25, [#allocation6], %s2489_s11, %s2489_s11, %s2490_s12  }
  0x28   : > { %s2357_s27 = scalar_lea.hbm %s3271_s3, 3072 }
  0x29   : > { %p2358_p2 = scmp.ne.s32.totalorder %s3271_s3, %s2357_s27  ;;  %p2364_p10 = scmp.lt.u32.totalorder %s2357_s27, %s3271_s3 }
  0x2b   : > { %p2360_p1 = pnand %p2358_p2, %p2331_p13 }
  0x2d   : > { %p2361_p6 = pneg %p2360_p1 }
  0x2f   : > { %p2366_p3 = pnand %p2364_p10, %p2361_p6 }
  0x31   : > { %2369 = shalt.err (!%p2366_p3)
}
  0x32   : > { %s2370_s25 = scalar_lea.vmem %s2580_s28, 3072  ;;  %p2378_p12 = scmp.lt.s32.totalorder %s2580_s28, %s2580_s28 }
  0x33   : > { %p2371_p5 = scmp.ne.s32.totalorder %s2580_s28, %s2370_s25  ;;  %p2379_p0 = scmp.lt.s32.totalorder %s2370_s25, %s2370_s25 }
  0x35   : > { %p2373_p7 = pnand %p2371_p5, %p2331_p13  ;;  %p2380_p2 = por %p2379_p0, %p2378_p12 }
  0x37   : > { %p2374_p9 = pneg %p2373_p7 }
  0x39   : > { %p2381_p1 = pnand %p2380_p2, %p2374_p9 }
  0x3b   : > { %2384 = shalt.err (!%p2381_p1)
}
  0x3c   : > { %s2491_s7 = smov 192   ;;  %s2492_s8 = smov 12  }
  0x3d   : > { %2195 = dma.hbm_to_vmem [thread:$0]  (!%p2576_p11), %s3271_s3, 3072, %s2580_s28, [#allocation6], %s2491_s7, %s2491_s7, %s2492_s8  }
  0x3e   : > { %s2635_s11 = sadd.s32 1, %s2485_s18   ;;  %s28_s13 = sadd.s32 1, %s2481_s17 }
  0x3f   : > { %s25_s12 = ssub.s32 %s2485_s18, %s2635_s11  ;;  %p35_p6 = scmp.ne.s32.totalorder %s2481_s17, %s2477_s16 }
  0x40   : > { %p26_p13 = scmp.eq.s32.totalorder %s25_s12, 0  ;;  %p36_p10 = scmp.eq.s32.totalorder %s2485_s18, 0 }
  0x41   : > { %p3361_p5 = scmp.eq.s32.totalorder %s2546_s19, 1  ;;  %p2206_p9 = scmp.lt.s32.totalorder %s2485_s18, 2 }
  0x42   : > { %s2644_s14 = scalar_select %p26_p13, %s2481_s17, %s28_s13  }
  0x43   : > { %p37_p3 = por %p36_p10, %p35_p6  ;;  %p2648_p7 = por %p3361_p5, %p35_p6 }
  0x44   : > { %s183_s26 = sand.u32 1, %s2481_s17   ;;  %s2174_s28 = smul.u32 1536, %s2485_s18 }
  0x45   : > { %s3362_s20 = scalar_select %p2648_p7, 1, 0 }
  0x46   : > { %s2173_s24 = smul.u32 96, %s183_s26  ;;  %p2655_p11 = pnand %p2206_p9, %p37_p3 }
  0x47   : > { %s2662_s5 = scalar_lea.hbm %s3268_s0, %s2174_s28  ;;  %s2666_s7 = scalar_lea.sflag [#allocation3], %s183_s26 }
  0x48   : > { %s187_s6 = scalar_lea.vmem [#allocation2], %s2173_s24  ;;  %s2385_s8 = scalar_lea.hbm %s2662_s5, 1536 }
  0x49   : > { %s195_s25 = sshll.u32 %s187_s6, 4  ;;  %p2386_p12 = scmp.ne.s32.totalorder %s2662_s5, %s2385_s8  ;;  %s2664_s25 = int_to_ptr.vmem [resolvable:$true] %s195_s25 }
  0x4a   : > { %p2387_p0 = pneg %p2655_p11  ;;  %s2390_s12 = scalar_lea.hbm %s3268_s0, 3072 }
  0x4b   : > { %p2391_p13 = scmp.lt.u32.totalorder %s2662_s5, %s3268_s0  ;;  %p2392_p6 = scmp.lt.u32.totalorder %s2390_s12, %s2385_s8 }
  0x4c   : > { %p2388_p2 = pnand %p2387_p0, %p2386_p12  ;;  %p2394_p3 = scmp.lt.u32.totalorder %s2385_s8, %s2662_s5 }
  0x4d   : > { %p2393_p10 = por %p2392_p6, %p2391_p13 }
  0x4e   : > { %p2389_p1 = pneg %p2388_p2 }
  0x4f   : > { %p2395_p5 = por %p2394_p3, %p2393_p10 }
  0x51   : > { %p2396_p9 = pnand %p2395_p5, %p2389_p1 }
  0x53   : > { %2399 = shalt.err (!%p2396_p9)
}
  0x54   : > { %s2400_s26 = scalar_lea.vmem %s2664_s25, 1536  ;;  %s2493_s24 = smov [#allocation2]  }
  0x55   : > { %p2401_p12 = scmp.ne.s32.totalorder %s2664_s25, %s2400_s26  ;;  %s2405_s29 = sshll.u32 %s2493_s24, 4  ;;  %s2406_s29 = int_to_ptr.vmem [resolvable:$false] %s2405_s29 }
  0x56   : > { %s2407_s30 = scalar_lea.vmem %s2406_s29, 3072  ;;  %p2408_p4 = scmp.lt.s32.totalorder %s2664_s25, %s2406_s29 }
  0x57   : > { %p2403_p2 = pnand %p2401_p12, %p2387_p0  ;;  %p2409_p13 = scmp.lt.s32.totalorder %s2407_s30, %s2400_s26 }
  0x59   : > { %p2404_p7 = pneg %p2403_p2  ;;  %p2410_p6 = por %p2409_p13, %p2408_p4 }
  0x5b   : > { %p2411_p10 = pnand %p2410_p6, %p2404_p7 }
  0x5d   : > { %2414 = shalt.err (!%p2411_p10)
}
  0x5e   : > { %s2494_s6 = smov 384   ;;  %s2495_s8 = smov 24  }
  0x5f   : > { %2199 = dma.hbm_to_vmem [thread:$0]  (!%p2655_p11), %s2662_s5, 1536, %s2664_s25, %s2666_s7, %s2494_s6, %s2494_s6, %s2495_s8  }
  0x60   : > { %207 = sbr.rel (%p2565_p8) target bundleno = 1223 (0x4c7), region = 36 }
  0x67   : > { %s2697_s9 = sand.u32 1, %s2477_s16   ;;  %p3364_p4 = scmp.ne.s32.totalorder %s3357_s21, 0 }
  0x68   : > { %s2175_s10 = smul.u32 96, %s2697_s9  ;;  %s210_s12 = scalar_lea.sflag [#allocation3], %s2697_s9 }
  0x6a   : > { %s2703_s13 = scalar_lea.vmem [#allocation2], %s2175_s10 }
  0x6b   : > { %2460 = dma.done.wait (%p3364_p4), %s210_s12, 1536  }
  0x6c   : > { %2462 = vsyncadd (%p3364_p4), %s210_s12, 4294965760  ;;  %p3365_p7 = scmp.eq.s32.totalorder %s2546_s19, 0 }
  0x6e   : > { %2464 = dma.done.wait (%p3365_p7), [#allocation6], 6144   ;;  %p3366_p8 = pmov %p3365_p7 }
  0x6f   : > { %v2713_v0 = vld [vmem:[#allocation5 + $0x40] sm:$0xff]   ;;  %v2721_v3 = vld [vmem:[#allocation5 + $0x48] sm:$0xff]   ;;  %v2731_v6 = vld [vmem:[#allocation5 + $0x50] sm:$0xff]   ;;  %s3192_s27 = scalar_lea.vmem [#allocation8], %s2175_s10  ;;  %s2176_s5 = smul.u32 1536, %s2546_s19 }
  0x70   : > { %2466 = vsyncadd (%p3366_p8), [#allocation6], 4294961152  ;;  %v2715_v1 = vld [vmem:[#allocation5 + $0x80] sm:$0xff]   ;;  %1773 = vmatprep.subr.bf16.mxu0 %v2713_v0  ;;  %v2725_v4 = vld [vmem:[#allocation5 + $0x88] sm:$0xff]   ;;  %s1617_s25 = sshll.u32 %s3192_s27, 4  ;;  %s1603_s26 = scalar_lea.sflag [#allocation4], %s2697_s9  ;;  %s3220_s25 = int_to_ptr.vmem [resolvable:$true] %s1617_s25 }
  0x71   : > { %v2718_v2 = vld [vmem:[#allocation5] sm:$0xff]   ;;  %1965 = vmatprep.subr.bf16.mxu1 %v2715_v1  ;;  %v2728_v5 = vld [vmem:[#allocation5 + $0x8] sm:$0xff]   ;;  %v2733_v7 = vld [vmem:[#allocation5 + $0x90] sm:$0xff]   ;;  %s3218_s28 = scalar_lea.hbm %s3272_s4, %s2176_s5  ;;  %s2415_s24 = scalar_lea.vmem %s3220_s25, 1536 }
  0x72   : > { %1774 = vmatpush3.bf16.msra.mxu0 %v2718_v2  ;;  %1966 = vmatpush3.bf16.msra.mxu1 %v2715_v1  ;;  %3367 = vst [vmem:[#allocation12_spill] sm:$0xff] %v2733_v7  ;;  %v2737_v8 = vld [vmem:[#allocation5 + $0x10] sm:$0xff]   ;;  %v2741_v9 = vld [vmem:[#allocation5 + $0x58] sm:$0xff]   ;;  %v2749_v12 = vld [vmem:[#allocation5 + $0x60] sm:$0xff]   ;;  %p2416_p11 = scmp.ne.s32.totalorder %s3220_s25, %s2415_s24  ;;  %p3459_p0 = scmp.ne.s32.totalorder %s3362_s20, 0 }
  0x73   : > { %1775 = vmatprep.subr.bf16.mxu0 %v2721_v3  ;;  %1967 = vmatprep.subr.bf16.mxu1 %v2725_v4  ;;  %v2743_v10 = vld [vmem:[#allocation5 + $0x98] sm:$0xff]   ;;  %3369 = vst [vmem:[#allocation14_spill] sm:$0xff] %v2749_v12  ;;  %v2753_v13 = vld [vmem:[#allocation5 + $0xa0] sm:$0xff]   ;;  %v2759_v15 = vld [vmem:[#allocation5 + $0x68] sm:$0xff]   ;;  %s2497_s29 = smov [#allocation8]  }
  0x74   : > { %3368 = vst [vmem:[#allocation13_spill] sm:$0xff] %v2743_v10  ;;  %v2745_v11 = vld [vmem:[#allocation5 + $0x18] sm:$0xff]   ;;  %3370 = vst [vmem:[#allocation15_spill] sm:$0xff] %v2753_v13  ;;  %v2755_v14 = vld [vmem:[#allocation5 + $0x20] sm:$0xff]   ;;  %p2417_p1 = pnand %p2416_p11, %p3459_p0  ;;  %s2419_s30 = sshll.u32 %s2497_s29, 4  ;;  %s2420_s30 = int_to_ptr.vmem [resolvable:$false] %s2419_s30 }
  0x75   : > { %3371 = vst [vmem:[#allocation16_spill] sm:$0xff] %v2755_v14  ;;  %3372 = vst [vmem:[#allocation17_spill] sm:$0xff] %v2759_v15  ;;  %v2763_v16 = vld [vmem:[#allocation5 + $0xa8] sm:$0xff]   ;;  %v2769_v18 = vld [vmem:[#allocation5 + $0x70] sm:$0xff]   ;;  %s2421_s6 = scalar_lea.vmem %s2420_s30, 3072  ;;  %p2422_p5 = scmp.lt.s32.totalorder %s3220_s25, %s2420_s30 }
  0x76   : > { %1776 = vmatpush3.bf16.msra.mxu0 %v2728_v5  ;;  %1968 = vmatpush3.bf16.msra.mxu1 %v2725_v4  ;;  %3373 = vst [vmem:[#allocation18_spill] sm:$0xff] %v2763_v16  ;;  %v2765_v17 = vld [vmem:[#allocation5 + $0x28] sm:$0xff]   ;;  %3375 = vst [vmem:[#allocation20_spill] sm:$0xff] %v2769_v18  ;;  %v2773_v19 = vld [vmem:[#allocation5 + $0xb0] sm:$0xff]   ;;  %p2418_p3 = pneg %p2417_p1  ;;  %p2423_p9 = scmp.lt.s32.totalorder %s2421_s6, %s2415_s24 }
  0x77   : > { %1777 = vmatprep.subr.bf16.mxu0 %v2731_v6  ;;  %1969 = vmatprep.subr.bf16.mxu1 %v2733_v7  ;;  %3374 = vst [vmem:[#allocation19_spill] sm:$0xff] %v2765_v17  ;;  %3376 = vst [vmem:[#allocation21_spill] sm:$0xff] %v2773_v19  ;;  %v2775_v20 = vld [vmem:[#allocation5 + $0x30] sm:$0xff]   ;;  %v2777_v21 = vld [vmem:[#allocation5 + $0x78] sm:$0xff]  }
  0x78   : > { %3377 = vst [vmem:[#allocation22_spill] sm:$0xff] %v2775_v20  ;;  %3378 = vst [vmem:[#allocation23_spill] sm:$0xff] %v2777_v21  ;;  %v2779_v22 = vld [vmem:[#allocation5 + $0xb8] sm:$0xff]   ;;  %v2784_v23 = vld [vmem:[%s2703_s13 + $0x8] sm:$0xff]  ;;  %p2424_p12 = por %p2423_p9, %p2422_p5 }
  0x79   : > { %3379 = vst [vmem:[#allocation24_spill] sm:$0xff] %v2779_v22  ;;  %3380 = vst [vmem:[#allocation25_spill] sm:$0xff] %v2784_v23  ;;  %v2787_v24 = vld [vmem:[%s2703_s13 + $0x20] sm:$0xff]  ;;  %v2799_v27 = vld [vmem:[%s2703_s13 + $0x18] sm:$0xff] }
  0x7a   : > { %1778 = vmatpush3.bf16.msra.mxu0 %v2737_v8  ;;  %1970 = vmatpush3.bf16.msra.mxu1 %v2733_v7  ;;  %3381 = vst [vmem:[#allocation26_spill] sm:$0xff] %v2787_v24  ;;  %v2790_v25 = vld [vmem:[%s2703_s13] sm:$0xff]  ;;  %v2796_v26 = vpack.c.bf16 %v2787_v24, %v2784_v23  ;;  %3383 = vst [vmem:[#allocation28_spill] sm:$0xff] %v2799_v27  ;;  %v2802_v28 = vld [vmem:[%s2703_s13 + $0x10] sm:$0xff]  ;;  %p2425_p2 = pnand %p2424_p12, %p2418_p3 }
  0x7b   : > { %1779 = vmatprep.subr.bf16.mxu0 %v2741_v9  ;;  %1971 = vmatprep.subr.bf16.mxu1 %v2743_v10  ;;  %3382 = vst [vmem:[#allocation27_spill] sm:$0xff] %v2790_v25  ;;  %3384 = vst [vmem:[#allocation29_spill] sm:$0xff] %v2802_v28  ;;  %v2805_v29 = vld [vmem:[%s2703_s13 + $0x28] sm:$0xff]  ;;  %v2807_v30 = vld [vmem:[#allocation5 + $0x38] sm:$0xff]   ;;  %v2811_v31 = vpack.c.bf16 %v2799_v27, %v2790_v25 }
  0x7c   : > { %3385 = vst [vmem:[#allocation30_spill] sm:$0xff] %v2805_v29  ;;  %3386 = vst [vmem:[#allocation31_spill] sm:$0xff] %v2807_v30  ;;  %v344_v32 = vpack.c.bf16 %v2805_v29, %v2802_v28  ;;  %v2816_v33 = vld [vmem:[%s2703_s13 + $0x40] sm:$0xff]  ;;  %v2819_v34 = vld [vmem:[%s2703_s13 + $0x58] sm:$0xff]  ;;  %v349_v36 = vunpack.c.l.bf16 %v2796_v26  ;;  %v352_v37 = vunpack.c.h.bf16 %v2796_v26 }
  0x7d   : > { %3387 = vst [vmem:[#allocation32_spill] sm:$0xff] %v2816_v33  ;;  %3388 = vst [vmem:[#allocation33_spill] sm:$0xff] %v2819_v34  ;;  %v2822_v35 = vld [vmem:[%s2703_s13 + $0x38] sm:$0xff]  ;;  %v2828_v38 = vpack.c.bf16 %v2819_v34, %v2816_v33  ;;  %v2831_v39 = vld [vmem:[%s2703_s13 + $0x50] sm:$0xff]  ;;  %v348_v42 = vunpack.c.l.bf16 %v2811_v31  ;;  %v351_v43 = vunpack.c.h.bf16 %v2811_v31 }
  0x7e   : > { %1780 = vmatpush3.bf16.msra.mxu0 %v2745_v11  ;;  %1972 = vmatpush3.bf16.msra.mxu1 %v2743_v10  ;;  %3389 = vst [vmem:[#allocation34_spill] sm:$0xff] %v2822_v35  ;;  %3390 = vst [vmem:[#allocation35_spill] sm:$0xff] %v2831_v39  ;;  %v2834_v40 = vld [vmem:[%s2703_s13 + $0x30] sm:$0xff]  ;;  %v2837_v41 = vld [vmem:[%s2703_s13 + $0x48] sm:$0xff]  ;;  %v350_v44 = vunpack.c.l.bf16 %v344_v32  ;;  %v353_v45 = vunpack.c.h.bf16 %v344_v32  ;;  %v361_v46 = vsub.f32 %v2784_v23, %v349_v36 }
  0x7f   : > { %1781 = vmatprep.subr.bf16.mxu0 %v2749_v12  ;;  %1973 = vmatprep.subr.bf16.mxu1 %v2753_v13  ;;  %3391 = vst [vmem:[#allocation36_spill] sm:$0xff] %v2834_v40  ;;  %3392 = vst [vmem:[#allocation37_spill] sm:$0xff] %v2837_v41  ;;  %v364_v47 = vsub.f32 %v2787_v24, %v352_v37  ;;  %v356_v48 = vunpack.c.l.bf16 %v2828_v38  ;;  %v359_v49 = vunpack.c.h.bf16 %v2828_v38 }
  0x80   : > { %v360_v50 = vsub.f32 %v2790_v25, %v348_v42  ;;  %v363_v51 = vsub.f32 %v2799_v27, %v351_v43  ;;  %v362_v52 = vsub.f32 %v2802_v28, %v350_v44  ;;  %v365_v53 = vsub.f32 %v2805_v29, %v353_v45 }
  0x81   : > { %v373_v54 = vpack.c.bf16 %v364_v47, %v361_v46  ;;  %v368_v55 = vsub.f32 %v2816_v33, %v356_v48  ;;  %v371_v56 = vsub.f32 %v2819_v34, %v359_v49  ;;  %v346_v57 = vpack.c.bf16 %v2831_v39, %v2822_v35  ;;  %v2906_v48 = vld [vmem:[#allocation7 + $0x1c] ss:$12 sps:$4 sm:$0xff]   ;;  %v2909_v49 = vld [vmem:[#allocation7 + $0x18] ss:$12 sps:$4 sm:$0xff]  }
  0x82   : > { %1782 = vmatpush3.bf16.msra.mxu0 %v2755_v14  ;;  %1974 = vmatpush3.bf16.msra.mxu1 %v2753_v13  ;;  %v372_v58 = vpack.c.bf16 %v363_v51, %v360_v50  ;;  %v374_v59 = vpack.c.bf16 %v365_v53, %v362_v52  ;;  %v345_v60 = vpack.c.bf16 %v2837_v41, %v2834_v40  ;;  %v2911_v50 = vld [vmem:[#allocation7 + $0x34] ss:$12 sps:$4 sm:$0xff]   ;;  %v2919_v51 = vld [vmem:[#allocation7 + $0x30] ss:$12 sps:$4 sm:$0xff]   ;;  %v2923_v52 = vld [vmem:[#allocation7 + $0x4c] ss:$12 sps:$4 sm:$0xff]  }
  0x83   : > { %1783 = vmatprep.subr.bf16.mxu0 %v2759_v15  ;;  %1975 = vmatprep.subr.bf16.mxu1 %v2763_v16  ;;  %v377_v61 = vpack.c.bf16 %v371_v56, %v368_v55  ;;  %v355_v62 = vunpack.c.l.bf16 %v346_v57  ;;  %v358_v63 = vunpack.c.h.bf16 %v346_v57  ;;  %3395 = vst [vmem:[#allocation40_spill] sm:$0xff] %v2919_v51  ;;  %3396 = vst [vmem:[#allocation41_spill] sm:$0xff] %v2923_v52  ;;  %v2929_v53 = vld [vmem:[#allocation7 + $0x48] ss:$12 sps:$4 sm:$0xff]   ;;  %v2934_v55 = vld [vmem:[#allocation7 + $0x38] ss:$12 sps:$4 sm:$0xff]  }
  0x84   : > { %554 = vmatprep.mubr.bf16.mxu0 %v373_v54  ;;  %1981 = vmatprep.mubr.bf16.mxu1 %v374_v59  ;;  %v354_v36 = vunpack.c.l.bf16 %v345_v60  ;;  %v357_v37 = vunpack.c.h.bf16 %v345_v60  ;;  %3397 = vst [vmem:[#allocation42_spill] sm:$0xff] %v2929_v53  ;;  %v2932_v54 = vld [vmem:[#allocation7 + $0x64] ss:$12 sps:$4 sm:$0xff]   ;;  %3399 = vst [vmem:[#allocation44_spill] sm:$0xff] %v2934_v55  ;;  %v2936_v56 = vld [vmem:[#allocation7 + $0x60] ss:$12 sps:$4 sm:$0xff]  }
  0x85   : > { %v367_v42 = vsub.f32 %v2822_v35, %v355_v62  ;;  %v370_v43 = vsub.f32 %v2831_v39, %v358_v63  ;;  %3398 = vst [vmem:[#allocation43_spill] sm:$0xff] %v2932_v54  ;;  %3400 = vst [vmem:[#allocation45_spill] sm:$0xff] %v2936_v56  ;;  %v2946_v59 = vld [vmem:[#allocation7 + $0x78] ss:$12 sps:$4 sm:$0xff]   ;;  %v2956_v62 = vld [vmem:[#allocation7 + $0x90] ss:$12 sps:$4 sm:$0xff]  }
  0x86   : > { %1784 = vmatpush3.bf16.msra.mxu0 %v2765_v17  ;;  %1976 = vmatpush3.bf16.msra.mxu1 %v2763_v16  ;;  %v366_v44 = vsub.f32 %v2834_v40, %v354_v36  ;;  %v369_v45 = vsub.f32 %v2837_v41, %v357_v37  ;;  %3403 = vst [vmem:[#allocation48_spill] sm:$0xff] %v2946_v59  ;;  %3406 = vst [vmem:[#allocation51_spill] sm:$0xff] %v2956_v62  ;;  %v2962_v63 = vld [vmem:[#allocation7 + $0xac] ss:$12 sps:$4 sm:$0xff]   ;;  %v2966_v37 = vld [vmem:[#allocation7 + $0xa8] ss:$12 sps:$4 sm:$0xff]  }
  0x87   : > { %1785 = vmatprep.subr.bf16.mxu0 %v2769_v18  ;;  %1977 = vmatprep.subr.bf16.mxu1 %v2773_v19  ;;  %v376_v46 = vpack.c.bf16 %v370_v43, %v367_v42  ;;  %3407 = vst [vmem:[#allocation52_spill] sm:$0xff] %v2962_v63  ;;  %v2964_v36 = vld [vmem:[#allocation7 + $0x80] ss:$12 sps:$4 sm:$0xff]   ;;  %3409 = vst [vmem:[#allocation54_spill] sm:$0xff] %v2966_v37  ;;  %v2972_v42 = vld [vmem:[#allocation7 + $0x98] ss:$12 sps:$4 sm:$0xff]  }
  0x88   : > { %v375_v47 = vpack.c.bf16 %v369_v45, %v366_v44  ;;  %3408 = vst [vmem:[#allocation53_spill] sm:$0xff] %v2964_v36  ;;  %3410 = vst [vmem:[#allocation55_spill] sm:$0xff] %v2972_v42  ;;  %v3281_v43 = vmov 0   ;;  %v2978_v44 = vld [vmem:[#allocation7 + $0xb0] ss:$12 sps:$4 sm:$0xff]  }
  0x89   : > { %3411 = vst [vmem:[#allocation56_spill] sm:$0xff] %v2978_v44 }
  0x8a   : > { %1786 = vmatpush3.bf16.msra.mxu0 %v2775_v20  ;;  %1978 = vmatpush3.bf16.msra.mxu1 %v2773_v19 }
  0x8b   : > { %1787 = vmatprep.subr.bf16.mxu0 %v2777_v21  ;;  %1979 = vmatprep.subr.bf16.mxu1 %v2779_v22 }
  0x8e   : > { %1788 = vmatpush3.bf16.msra.mxu0 %v2807_v30  ;;  %1980 = vmatpush3.bf16.msra.mxu1 %v2779_v22 }
  0x8f   : > { %1811 = vmatprep.subr.bf16.mxu0 %v2713_v0  ;;  %1985 = vmatprep.subr.bf16.mxu1 %v2715_v1 }
  0x91   : > { %555 = vmatmul.mubr.bf16.vlgmr.msra.gmra.mrb[0].mxu0 %v372_v58  ;;  %1982 = vmatmul.mubr.bf16.vlgmr.msra.gmra.mrb[0].mxu1 %v377_v61  ;;  %v2944_v58 = vld [vmem:[#allocation7 + $0x50] ss:$12 sps:$4 sm:$0xff]   ;;  %v2954_v61 = vld [vmem:[#allocation7 + $0x68] ss:$12 sps:$4 sm:$0xff]  }
  0x92   : > { %1812 = vmatpush3.bf16.msra.mxu0 %v2718_v2  ;;  %1986 = vmatpush3.bf16.msra.mxu1 %v2715_v1  ;;  %3402 = vst [vmem:[#allocation47_spill] sm:$0xff] %v2944_v58  ;;  %3405 = vst [vmem:[#allocation50_spill] sm:$0xff] %v2954_v61 }
  0x93   : > { %1813 = vmatprep.subr.bf16.mxu0 %v2721_v3  ;;  %1987 = vmatprep.subr.bf16.mxu1 %v2725_v4 }
  0x94   : > { %2001 = vmatprep.mubr.bf16.mxu1 %v344_v32  ;;  %562 = vmatprep.mubr.bf16.mxu0 %v376_v46  ;;  %v2902_v32 = vld [vmem:[#allocation7] ss:$12 sps:$4 sm:$0xff]  }
  0x96   : > { %1814 = vmatpush3.bf16.msra.mxu0 %v2728_v5  ;;  %1988 = vmatpush3.bf16.msra.mxu1 %v2725_v4 }
  0x97   : > { %1815 = vmatprep.subr.bf16.mxu0 %v2731_v6  ;;  %1989 = vmatprep.subr.bf16.mxu1 %v2733_v7 }
  0x99   : > { %563 = vmatmul.mubr.bf16.gmra.mrb[4].mxu0 %v375_v47 }
  0x9a   : > { %1816 = vmatpush3.bf16.msra.mxu0 %v2737_v8  ;;  %1990 = vmatpush3.bf16.msra.mxu1 %v2733_v7 }
  0x9b   : > { %1817 = vmatprep.subr.bf16.mxu0 %v2741_v9  ;;  %1991 = vmatprep.subr.bf16.mxu1 %v2743_v10 }
  0x9c   : > { %652 = vmatprep.mubr.bf16.mxu0 %v2796_v26  ;;  %v2900_v26 = vld [vmem:[#allocation7 + $0x4] ss:$12 sps:$4 sm:$0xff]  }
  0x9d   : > { %3393 = vst [vmem:[#allocation38_spill] sm:$0xff] %v2900_v26 }
  0x9e   : > { %1818 = vmatpush3.bf16.msra.mxu0 %v2745_v11  ;;  %1992 = vmatpush3.bf16.msra.mxu1 %v2743_v10 }
  0x9f   : > { %1819 = vmatprep.subr.bf16.mxu0 %v2749_v12  ;;  %1993 = vmatprep.subr.bf16.mxu1 %v2753_v13 }
  0xa2   : > { %1820 = vmatpush3.bf16.msra.mxu0 %v2755_v14  ;;  %1994 = vmatpush3.bf16.msra.mxu1 %v2753_v13 }
  0xa3   : > { %1821 = vmatprep.subr.bf16.mxu0 %v2759_v15  ;;  %1995 = vmatprep.subr.bf16.mxu1 %v2763_v16 }
  0xa6   : > { %1822 = vmatpush3.bf16.msra.mxu0 %v2765_v17  ;;  %1996 = vmatpush3.bf16.msra.mxu1 %v2763_v16 }
  0xa7   : > { %1823 = vmatprep.subr.bf16.mxu0 %v2769_v18  ;;  %1997 = vmatprep.subr.bf16.mxu1 %v2773_v19 }
  0xaa   : > { %1824 = vmatpush3.bf16.msra.mxu0 %v2775_v20  ;;  %1998 = vmatpush3.bf16.msra.mxu1 %v2773_v19 }
  0xab   : > { %1825 = vmatprep.subr.bf16.mxu0 %v2777_v21  ;;  %1999 = vmatprep.subr.bf16.mxu1 %v2779_v22 }
  0xae   : > { %1826 = vmatpush3.bf16.msra.mxu0 %v2807_v30  ;;  %2000 = vmatpush3.bf16.msra.mxu1 %v2779_v22 }
  0xaf   : > { %862 = vmatprep.subr.bf16.mxu0 %v2900_v26 }
  0xb1   : > { %653 = vmatmul.mubr.bf16.vlgmr.msra.gmra.mrb[8].mxu0 %v2811_v31  ;;  %2002 = vmatmul.mubr.bf16.vlgmr.msra.gmra.mrb[0].mxu1 %v2828_v38  ;;  %v2913_v31 = vld [vmem:[#allocation7 + $0x8] ss:$12 sps:$4 sm:$0xff]   ;;  %v2915_v38 = vld [vmem:[#allocation7 + $0x20] ss:$12 sps:$4 sm:$0xff]  }
  0xb2   : > { %660 = vmatprep.mubr.bf16.mxu0 %v346_v57  ;;  %863 = vmatpush1.bf16.msra.mxu0 %v2902_v32  ;;  %3394 = vst [vmem:[#allocation39_spill] sm:$0xff] %v2915_v38  ;;  %v2942_v57 = vld [vmem:[#allocation7 + $0x7c] ss:$12 sps:$4 sm:$0xff]  }
  0xb3   : > { %864 = vmatprep.subr.bf16.mxu0 %v2906_v48  ;;  %2005 = vmatprep.subr.bf16.mxu1 %v2913_v31  ;;  %3401 = vst [vmem:[#allocation46_spill] sm:$0xff] %v2942_v57 }
  0xb4   : > { %2006 = vmatpush3.bf16.msra.mxu1 %v2913_v31 }
  0xb5   : > { %2007 = vmatprep.subr.bf16.mxu1 %v2915_v38 }
  0xb6   : > { %865 = vmatpush1.bf16.msra.mxu0 %v2909_v49 }
  0xb7   : > { %866 = vmatprep.subr.bf16.mxu0 %v2911_v50 }
  0xb8   : > { %2008 = vmatpush3.bf16.msra.mxu1 %v2915_v38 }
  0xb9   : > { %661 = vmatmul.mubr.bf16.gmra.mrb[12].mxu0 %v345_v60  ;;  %2009 = vmatprep.subr.bf16.mxu1 %v2934_v55  ;;  %v2952_v60 = vld [vmem:[#allocation7 + $0x94] ss:$12 sps:$4 sm:$0xff]  }
  0xba   : > { %867 = vmatpush1.bf16.msra.mxu0 %v2919_v51  ;;  %3404 = vst [vmem:[#allocation49_spill] sm:$0xff] %v2952_v60  ;;  %894 = vmatprep.mubr.bf16.mxu0 %v3281_v43 }
  0xbb   : > { %868 = vmatprep.subr.bf16.mxu0 %v2923_v52 }
  0xbc   : > { %2010 = vmatpush3.bf16.msra.mxu1 %v2934_v55 }
  0xbd   : > { %2011 = vmatprep.subr.bf16.mxu1 %v2944_v58 }
  0xbe   : > { %869 = vmatpush1.bf16.msra.mxu0 %v2929_v53 }
  0xbf   : > { %870 = vmatprep.subr.bf16.mxu0 %v2932_v54 }
  0xc0   : > { %2012 = vmatpush3.bf16.msra.mxu1 %v2944_v58 }
  0xc1   : > { %2013 = vmatprep.subr.bf16.mxu1 %v2954_v61 }
  0xc2   : > { %871 = vmatpush1.bf16.msra.mxu0 %v2936_v56 }
  0xc3   : > { %872 = vmatprep.subr.bf16.mxu0 %v2942_v57 }
  0xc4   : > { %2014 = vmatpush3.bf16.msra.mxu1 %v2954_v61 }
  0xc5   : > { %2015 = vmatprep.subr.bf16.mxu1 %v2964_v36 }
  0xc6   : > { %873 = vmatpush1.bf16.msra.mxu0 %v2946_v59 }
  0xc7   : > { %874 = vmatprep.subr.bf16.mxu0 %v2952_v60 }
  0xc8   : > { %2016 = vmatpush3.bf16.msra.mxu1 %v2964_v36 }
  0xc9   : > { %2017 = vmatprep.subr.bf16.mxu1 %v2972_v42 }
  0xca   : > { %875 = vmatpush1.bf16.msra.mxu0 %v2956_v62 }
  0xcb   : > { %876 = vmatprep.subr.bf16.mxu0 %v2962_v63 }
  0xcc   : > { %2018 = vmatpush3.bf16.msra.mxu1 %v2972_v42 }
  0xcd   : > { %2019 = vmatprep.subr.bf16.mxu1 %v2978_v44 }
  0xce   : > { %877 = vmatpush1.bf16.msra.mxu0 %v2966_v37 }
  0xcf   : > { %964 = vmatprep.subr.bf16.mxu0 %v2900_v26 }
  0xd0   : > { %2020 = vmatpush3.bf16.msra.mxu1 %v2978_v44 }
  0xd1   : > { %2025 = vmatprep.subr.bf16.mxu1 %v2913_v31 }
 0x164   : > { %v1789_v45 = vpop.f32.mrb[0].mxu0 }
 0x165   : > { %v1790_v46 = vpop.f32.mrb[1].mxu0 }
 0x166   : > { %v1791_v47 = vadd.f32 %v1790_v46, %v1789_v45  ;;  %v1792_v29 = vpop.f32.mrb[2].mxu0 }
 0x167   : > { %v1793_v26 = vpop.f32.mrb[3].mxu0 }
 0x168   : > { %v1794_v39 = vadd.f32 %v1793_v26, %v1792_v29 }
 0x16c   : > { %v1795_v34 = vpop.f32.mrb[4].mxu0 }
 0x16d   : > { %v1796_v43 = vpop.f32.mrb[5].mxu0 }
 0x16e   : > { %v1797_v41 = vadd.f32 %v1796_v43, %v1795_v34  ;;  %v1798_v28 = vpop.f32.mrb[6].mxu0 }
 0x16f   : > { %v1799_v35 = vpop.f32.mrb[7].mxu0 }
 0x170   : > { %v1800_v33 = vadd.f32 %v1799_v35, %v1798_v28 }
 0x184   : > { %v1827_v40 = vpop.f32.mrb[8].mxu0  ;;  %v2003_v24 = vpop.f32.mrb[0].mxu1 }
 0x185   : > { %v1828_v27 = vpop.f32.mrb[9].mxu0  ;;  %v703_v23 = vpop.f32.mrb[1].mxu1 }
 0x186   : > { %v1829_v25 = vadd.f32 %v1828_v27, %v1827_v40  ;;  %v1830_v22 = vpop.f32.mrb[10].mxu0  ;;  %v2004_v19 = vpop.f32.mrb[2].mxu1 }
 0x187   : > { %v1831_v30 = vpop.f32.mrb[11].mxu0  ;;  %v706_v21 = vpop.f32.mrb[3].mxu1 }
 0x188   : > { %v2127_v16 = vadd.f32 %v1829_v25, %v1791_v47  ;;  %v1832_v45 = vadd.f32 %v1831_v30, %v1830_v22  ;;  %v3421_v47 = vld [vmem:[#allocation22_spill] sm:$0xff] }
 0x18a   : > { %v2128_v46 = vadd.f32 %v2127_v16, %v703_v23  ;;  %v2131_v20 = vadd.f32 %v1832_v45, %v1794_v39  ;;  %v3422_v45 = vld [vmem:[#allocation18_spill] sm:$0xff] }
 0x18c   : > { %v2132_v29 = vadd.f32 %v2131_v20, %v706_v21  ;;  %v1833_v26 = vpop.f32.mrb[12].mxu0  ;;  %v718_v34 = vmul.f32 0.020833334, %v2128_v46  ;;  %v3423_v46 = vld [vmem:[#allocation23_spill] sm:$0xff] }
 0x18d   : > { %v1834_v18 = vpop.f32.mrb[13].mxu0 }
 0x18e   : > { %v719_v43 = vmul.f32 0.020833334, %v2132_v29  ;;  %v1835_v13 = vadd.f32 %v1834_v18, %v1833_v26  ;;  %v1836_v28 = vpop.f32.mrb[14].mxu0  ;;  %v3412_v18 = vmov 0   ;;  %v3424_v29 = vld [vmem:[#allocation31_spill] sm:$0xff]  ;;  %v3425_v26 = vld [vmem:[#allocation21_spill] sm:$0xff] }
 0x18f   : > { %v1837_v35 = vpop.f32.mrb[15].mxu0 }
 0x190   : > { %v722_v17 = vpack.c.bf16 %v719_v43, %v718_v34  ;;  %v2125_v15 = vadd.f32 %v1835_v13, %v1797_v41  ;;  %v1838_v10 = vadd.f32 %v1837_v35, %v1836_v28  ;;  %v3420_v41 = vld [vmem:[#allocation20_spill] sm:$0xff]  ;;  %v3427_v28 = vld [vmem:[#allocation27_spill] sm:$0xff] }
 0x192   : > { %v724_v27 = vunpack.c.l.bf16 %v722_v17  ;;  %v725_v40 = vunpack.c.h.bf16 %v722_v17  ;;  %v2126_v14 = vadd.f32 %v2125_v15, %v2003_v24  ;;  %v2129_v12 = vadd.f32 %v1838_v10, %v1800_v33  ;;  %v3413_v10 = vld [vmem:[#allocation12_spill] sm:$0xff]  ;;  %v3418_v24 = vld [vmem:[#allocation19_spill] sm:$0xff] }
 0x193   : > { %v3419_v33 = vld [vmem:[#allocation15_spill] sm:$0xff] }
 0x194   : > { %v728_v7 = vsub.f32 %v718_v34, %v724_v27  ;;  %v729_v25 = vsub.f32 %v719_v43, %v725_v40  ;;  %v2130_v22 = vadd.f32 %v2129_v12, %v2004_v19  ;;  %v720_v23 = vmul.f32 0.020833334, %v2126_v14  ;;  %v3414_v12 = vld [vmem:[#allocation14_spill] sm:$0xff]  ;;  %v3415_v14 = vld [vmem:[#allocation16_spill] sm:$0xff]  ;;  %v3417_v19 = vld [vmem:[#allocation17_spill] sm:$0xff] }
 0x195   : > { %v3426_v34 = vld [vmem:[#allocation24_spill] sm:$0xff]  ;;  %v3428_v40 = vld [vmem:[#allocation25_spill] sm:$0xff] }
 0x196   : > { %v732_v16 = vpack.c.bf16 %v729_v25, %v728_v7  ;;  %v721_v20 = vmul.f32 0.020833334, %v2130_v22 }
 0x198   : > { %v723_v21 = vpack.c.bf16 %v721_v20, %v720_v23  ;;  %895 = vmatmul.mubr.bf16.vlgmr.msra.gmra.mrb[16].mxu0 %v732_v16  ;;  %2021 = vmatprep.mubr.bf16.mxu1 %v732_v16  ;;  %v3429_v16 = vld [vmem:[#allocation28_spill] sm:$0xff] }
 0x199   : > { %965 = vmatpush1.bf16.msra.mxu0 %v2902_v32  ;;  %904 = vmatprep.mubr.bf16.mxu0 %v3412_v18 }
 0x19a   : > { %966 = vmatprep.subr.bf16.mxu0 %v2906_v48  ;;  %v726_v13 = vunpack.c.l.bf16 %v723_v21  ;;  %v727_v30 = vunpack.c.h.bf16 %v723_v21 }
 0x19c   : > { %v730_v39 = vsub.f32 %v720_v23, %v726_v13  ;;  %v731_v15 = vsub.f32 %v721_v20, %v727_v30 }
 0x19d   : > { %967 = vmatpush1.bf16.msra.mxu0 %v2909_v49 }
 0x19e   : > { %968 = vmatprep.subr.bf16.mxu0 %v2911_v50  ;;  %v733_v7 = vpack.c.bf16 %v731_v15, %v730_v39 }
 0x1a0   : > { %905 = vmatmul.mubr.bf16.gmra.mrb[20].mxu0 %v733_v7  ;;  %2022 = vmatmul.mubr.bf16.vlgmr.msra.gmra.mrb[4].mxu1 %v733_v7 }
 0x1a1   : > { %969 = vmatpush1.bf16.msra.mxu0 %v2919_v51  ;;  %2026 = vmatpush3.bf16.msra.mxu1 %v2913_v31  ;;  %v3437_v51 = vld [vmem:[#allocation35_spill] sm:$0xff] }
 0x1a2   : > { %2041 = vmatprep.mubr.bf16.mxu1 %v722_v17  ;;  %970 = vmatprep.subr.bf16.mxu0 %v2923_v52 }
 0x1a3   : > { %2027 = vmatprep.subr.bf16.mxu1 %v2915_v38  ;;  %996 = vmatprep.mubr.bf16.mxu0 %v3412_v18 }
 0x1a5   : > { %971 = vmatpush1.bf16.msra.mxu0 %v2929_v53  ;;  %2028 = vmatpush3.bf16.msra.mxu1 %v2915_v38 }
 0x1a6   : > { %972 = vmatprep.subr.bf16.mxu0 %v2932_v54  ;;  %2029 = vmatprep.subr.bf16.mxu1 %v2934_v55 }
 0x1a9   : > { %973 = vmatpush1.bf16.msra.mxu0 %v2936_v56  ;;  %2030 = vmatpush3.bf16.msra.mxu1 %v2934_v55  ;;  %v3436_v55 = vld [vmem:[#allocation33_spill] sm:$0xff] }
 0x1aa   : > { %974 = vmatprep.subr.bf16.mxu0 %v2942_v57  ;;  %2031 = vmatprep.subr.bf16.mxu1 %v2944_v58 }
 0x1ad   : > { %975 = vmatpush1.bf16.msra.mxu0 %v2946_v59  ;;  %2032 = vmatpush3.bf16.msra.mxu1 %v2944_v58  ;;  %v3434_v59 = vld [vmem:[#allocation29_spill] sm:$0xff] }
 0x1ae   : > { %976 = vmatprep.subr.bf16.mxu0 %v2952_v60  ;;  %2033 = vmatprep.subr.bf16.mxu1 %v2954_v61 }
 0x1b1   : > { %977 = vmatpush1.bf16.msra.mxu0 %v2956_v62  ;;  %2034 = vmatpush3.bf16.msra.mxu1 %v2954_v61 }
 0x1b2   : > { %978 = vmatprep.subr.bf16.mxu0 %v2962_v63  ;;  %2035 = vmatprep.subr.bf16.mxu1 %v2964_v36 }
 0x1b5   : > { %979 = vmatpush1.bf16.msra.mxu0 %v2966_v37  ;;  %2036 = vmatpush3.bf16.msra.mxu1 %v2964_v36 }
 0x1b6   : > { %2037 = vmatprep.subr.bf16.mxu1 %v2972_v42  ;;  %1869 = vmatprep.subr.bf16.mxu0 %v2713_v0 }
 0x1b8   : > { %997 = vmatmul.mubr.bf16.vlgmr.msra.gmra.mrb[16].mxu0 %v722_v17  ;;  %v3416_v17 = vld [vmem:[#allocation13_spill] sm:$0xff] }
 0x1b9   : > { %2038 = vmatpush3.bf16.msra.mxu1 %v2972_v42  ;;  %1006 = vmatprep.mubr.bf16.mxu0 %v3412_v18 }
 0x1ba   : > { %2039 = vmatprep.subr.bf16.mxu1 %v2978_v44  ;;  %1870 = vmatpush3.bf16.msra.mxu0 %v2718_v2 }
 0x1bb   : > { %1871 = vmatprep.subr.bf16.mxu0 %v2721_v3 }
 0x1bd   : > { %2040 = vmatpush3.bf16.msra.mxu1 %v2978_v44 }
 0x1be   : > { %1872 = vmatpush3.bf16.msra.mxu0 %v2728_v5  ;;  %2045 = vmatprep.subr.bf16.mxu1 %v2715_v1 }
 0x1bf   : > { %1873 = vmatprep.subr.bf16.mxu0 %v2731_v6 }
 0x1c0   : > { %1007 = vmatmul.mubr.bf16.gmra.mrb[20].mxu0 %v723_v21  ;;  %2042 = vmatmul.mubr.bf16.vlgmr.msra.gmra.mrb[4].mxu1 %v723_v21  ;;  %v3430_v21 = vld [vmem:[#allocation26_spill] sm:$0xff] }
 0x1c1   : > { %2046 = vmatpush3.bf16.msra.mxu1 %v2715_v1 }
 0x1c2   : > { %1874 = vmatpush3.bf16.msra.mxu0 %v2737_v8  ;;  %2047 = vmatprep.subr.bf16.mxu1 %v2725_v4 }
 0x1c3   : > { %1875 = vmatprep.subr.bf16.mxu0 %v2741_v9 }
 0x1c5   : > { %2048 = vmatpush3.bf16.msra.mxu1 %v2725_v4 }
 0x1c6   : > { %1876 = vmatpush3.bf16.msra.mxu0 %v2745_v11  ;;  %2049 = vmatprep.subr.bf16.mxu1 %v3413_v10 }
 0x1c7   : > { %1877 = vmatprep.subr.bf16.mxu0 %v3414_v12 }
 0x1c9   : > { %2050 = vmatpush3.bf16.msra.mxu1 %v3413_v10 }
 0x1ca   : > { %1878 = vmatpush3.bf16.msra.mxu0 %v3415_v14  ;;  %2051 = vmatprep.subr.bf16.mxu1 %v3416_v17 }
 0x1cb   : > { %1879 = vmatprep.subr.bf16.mxu0 %v3417_v19 }
 0x1cd   : > { %2052 = vmatpush3.bf16.msra.mxu1 %v3416_v17 }
 0x1ce   : > { %1880 = vmatpush3.bf16.msra.mxu0 %v3418_v24  ;;  %2053 = vmatprep.subr.bf16.mxu1 %v3419_v33 }
 0x1cf   : > { %1881 = vmatprep.subr.bf16.mxu0 %v3420_v41 }
 0x1d1   : > { %2054 = vmatpush3.bf16.msra.mxu1 %v3419_v33 }
 0x1d2   : > { %1882 = vmatpush3.bf16.msra.mxu0 %v3421_v47  ;;  %2055 = vmatprep.subr.bf16.mxu1 %v3422_v45 }
 0x1d3   : > { %1883 = vmatprep.subr.bf16.mxu0 %v3423_v46 }
 0x1d5   : > { %2056 = vmatpush3.bf16.msra.mxu1 %v3422_v45 }
 0x1d6   : > { %1884 = vmatpush3.bf16.msra.mxu0 %v3424_v29  ;;  %2057 = vmatprep.subr.bf16.mxu1 %v3425_v26 }
 0x1d7   : > { %1907 = vmatprep.subr.bf16.mxu0 %v2713_v0 }
 0x1d9   : > { %2058 = vmatpush3.bf16.msra.mxu1 %v3425_v26 }
 0x1da   : > { %2059 = vmatprep.subr.bf16.mxu1 %v3426_v34 }
 0x1dd   : > { %2060 = vmatpush3.bf16.msra.mxu1 %v3426_v34 }
 0x1de   : > { %2065 = vmatprep.subr.bf16.mxu1 %v2715_v1 }
 0x28b   : > { %v998_v43 = vpop.f32.mrb[16].mxu0 }
 0x28c   : > { %v1066_v35 = vsub.f32 %v3427_v28, %v998_v43  ;;  %v1000_v27 = vpop.f32.mrb[17].mxu0 }
 0x28d   : > { %v1067_v25 = vsub.f32 %v3428_v40, %v1000_v27  ;;  %v1002_v22 = vpop.f32.mrb[18].mxu0  ;;  %v3431_v27 = vld [vmem:[#allocation36_spill] sm:$0xff] }
 0x28e   : > { %v1069_v23 = vsub.f32 %v3429_v16, %v1002_v22  ;;  %v1004_v20 = vpop.f32.mrb[19].mxu0  ;;  %v1078_v13 = vmul.f32 %v1066_v35, %v1066_v35 }
 0x28f   : > { %v1070_v0 = vsub.f32 %v3430_v21, %v1004_v20  ;;  %v1079_v39 = vmul.f32 %v1067_v25, %v1067_v25  ;;  %v3432_v25 = vld [vmem:[#allocation32_spill] sm:$0xff]  ;;  %v3433_v21 = vld [vmem:[#allocation34_spill] sm:$0xff] }
 0x290   : > { %v1081_v30 = vmul.f32 %v1069_v23, %v1069_v23 }
 0x291   : > { %v1082_v15 = vmul.f32 %v1070_v0, %v1070_v0 }
 0x292   : > { %v3054_v7 = vpack.c.bf16 %v1081_v30, %v1078_v13 }
 0x293   : > { %v3056_v44 = vpack.c.bf16 %v1082_v15, %v1079_v39  ;;  %v1008_v37 = vpop.f32.mrb[20].mxu0  ;;  %v2043_v42 = vpop.f32.mrb[4].mxu1 }
 0x294   : > { %v1096_v43 = vunpack.c.l.bf16 %v3054_v7  ;;  %v1099_v28 = vunpack.c.h.bf16 %v3054_v7  ;;  %v1072_v40 = vsub.f32 %v3431_v27, %v1008_v37  ;;  %v1010_v22 = vpop.f32.mrb[21].mxu0  ;;  %v1051_v16 = vpop.f32.mrb[5].mxu1  ;;  %v1074_v23 = vsub.f32 %v3432_v25, %v2043_v42  ;;  %v3435_v27 = vld [vmem:[#allocation37_spill] sm:$0xff]  ;;  %v3438_v42 = vld [vmem:[#allocation30_spill] sm:$0xff] }
 0x295   : > { %v1097_v20 = vunpack.c.l.bf16 %v3056_v44  ;;  %v1100_v35 = vunpack.c.h.bf16 %v3056_v44  ;;  %v1073_v0 = vsub.f32 %v3433_v21, %v1010_v22  ;;  %v1012_v63 = vpop.f32.mrb[22].mxu0  ;;  %v2044_v62 = vpop.f32.mrb[6].mxu1  ;;  %v1068_v61 = vsub.f32 %v3434_v59, %v1051_v16 }
 0x296   : > { %v1108_v36 = vsub.f32 %v1078_v13, %v1096_v43  ;;  %v1111_v60 = vsub.f32 %v1081_v30, %v1099_v28  ;;  %v1014_v57 = vpop.f32.mrb[23].mxu0  ;;  %v1054_v56 = vpop.f32.mrb[7].mxu1  ;;  %v1084_v37 = vmul.f32 %v1072_v40, %v1072_v40  ;;  %v1075_v54 = vsub.f32 %v3435_v27, %v1012_v63 }
 0x297   : > { %v1112_v58 = vsub.f32 %v1082_v15, %v1100_v35  ;;  %v1077_v52 = vsub.f32 %v3436_v55, %v2044_v62  ;;  %v1076_v38 = vsub.f32 %v3437_v51, %v1014_v57  ;;  %v1071_v25 = vsub.f32 %v3438_v42, %v1054_v56 }
 0x298   : > { %v1120_v53 = vpack.c.bf16 %v1111_v60, %v1108_v36  ;;  %v1086_v22 = vmul.f32 %v1074_v23, %v1074_v23  ;;  %v1085_v21 = vmul.f32 %v1073_v0, %v1073_v0  ;;  %v1087_v18 = vmul.f32 %v1075_v54, %v1075_v54 }
 0x299   : > { %v1109_v13 = vsub.f32 %v1079_v39, %v1097_v20  ;;  %v1080_v30 = vmul.f32 %v1068_v61, %v1068_v61  ;;  %v1089_v43 = vmul.f32 %v1077_v52, %v1077_v52  ;;  %v1088_v59 = vmul.f32 %v1076_v38, %v1076_v38 }
 0x29a   : > { %v1083_v28 = vmul.f32 %v1071_v25, %v1071_v25  ;;  %v3070_v16 = vpack.c.bf16 %v1087_v18, %v1084_v37 }
 0x29b   : > { %v1121_v15 = vpack.c.bf16 %v1112_v58, %v1109_v13  ;;  %v3072_v40 = vpack.c.bf16 %v1089_v43, %v1086_v22  ;;  %v1094_v60 = vpack.c.bf16 %v1088_v59, %v1085_v21 }
 0x29c   : > { %v1092_v63 = vpack.c.bf16 %v1083_v28, %v1080_v30  ;;  %v1102_v55 = vunpack.c.l.bf16 %v3070_v16  ;;  %v1105_v51 = vunpack.c.h.bf16 %v3070_v16 }
 0x29d   : > { %1158 = vmatprep.mubr.bf16.mxu0 %v1121_v15  ;;  %v1104_v56 = vunpack.c.l.bf16 %v3072_v40  ;;  %v1107_v54 = vunpack.c.h.bf16 %v3072_v40  ;;  %v1103_v57 = vunpack.c.l.bf16 %v1094_v60  ;;  %v1106_v52 = vunpack.c.h.bf16 %v1094_v60 }
 0x29e   : > { %1159 = vmatmul.mubr.bf16.vlgmr.msra.gmra.mrb[24].mxu0 %v1120_v53  ;;  %v1117_v38 = vsub.f32 %v1087_v18, %v1105_v51  ;;  %v1098_v61 = vunpack.c.l.bf16 %v1092_v63  ;;  %v1101_v62 = vunpack.c.h.bf16 %v1092_v63  ;;  %v1114_v58 = vsub.f32 %v1084_v37, %v1102_v55  ;;  %v3449_v18 = vld [vmem:[#allocation46_spill] sm:$0xff] }
 0x29f   : > { %1908 = vmatpush3.bf16.msra.mxu0 %v2718_v2  ;;  %v1116_v36 = vsub.f32 %v1086_v22, %v1104_v56  ;;  %v1119_v39 = vsub.f32 %v1089_v43, %v1107_v54  ;;  %v1118_v20 = vsub.f32 %v1088_v59, %v1106_v52  ;;  %v1115_v35 = vsub.f32 %v1085_v21, %v1103_v57 }
 0x2a0   : > { %1909 = vmatprep.subr.bf16.mxu0 %v2721_v3  ;;  %v1113_v23 = vsub.f32 %v1083_v28, %v1101_v62  ;;  %v1110_v0 = vsub.f32 %v1080_v30, %v1098_v61  ;;  %v1123_v27 = vpack.c.bf16 %v1117_v38, %v1114_v58  ;;  %v3440_v2 = vmov 0   ;;  %v3441_v3 = vld [vmem:[#allocation39_spill] sm:$0xff] }
 0x2a1   : > { %v1125_v42 = vpack.c.bf16 %v1119_v39, %v1116_v36  ;;  %v1124_v25 = vpack.c.bf16 %v1118_v20, %v1115_v35 }
 0x2a2   : > { %v1122_v53 = vpack.c.bf16 %v1113_v23, %v1110_v0 }
 0x2a3   : > { %1910 = vmatpush3.bf16.msra.mxu0 %v2728_v5  ;;  %1166 = vmatprep.mubr.bf16.mxu0 %v1124_v25  ;;  %v3443_v5 = vld [vmem:[#allocation41_spill] sm:$0xff] }
 0x2a4   : > { %1911 = vmatprep.subr.bf16.mxu0 %v2731_v6  ;;  %2061 = vmatprep.mubr.bf16.mxu1 %v1122_v53  ;;  %v3444_v6 = vld [vmem:[#allocation44_spill] sm:$0xff] }
 0x2a5   : > { %2062 = vmatmul.mubr.bf16.vlgmr.msra.gmra.mrb[8].mxu1 %v1125_v42 }
 0x2a6   : > { %1167 = vmatmul.mubr.bf16.gmra.mrb[28].mxu0 %v1123_v27  ;;  %2066 = vmatpush3.bf16.msra.mxu1 %v2715_v1  ;;  %v3439_v1 = vld [vmem:[#allocation38_spill] sm:$0xff] }
 0x2a7   : > { %1912 = vmatpush3.bf16.msra.mxu0 %v2737_v8  ;;  %1256 = vmatprep.mubr.bf16.mxu0 %v3056_v44  ;;  %v3445_v8 = vld [vmem:[#allocation42_spill] sm:$0xff]  ;;  %v3448_v44 = vld [vmem:[#allocation45_spill] sm:$0xff] }
 0x2a8   : > { %2081 = vmatprep.mubr.bf16.mxu1 %v1092_v63  ;;  %1913 = vmatprep.subr.bf16.mxu0 %v2741_v9  ;;  %v3446_v9 = vld [vmem:[#allocation43_spill] sm:$0xff] }
 0x2a9   : > { %2067 = vmatprep.subr.bf16.mxu1 %v2725_v4 }
 0x2aa   : > { %2068 = vmatpush3.bf16.msra.mxu1 %v2725_v4  ;;  %v3442_v4 = vld [vmem:[#allocation40_spill] sm:$0xff] }
 0x2ab   : > { %1914 = vmatpush3.bf16.msra.mxu0 %v2745_v11  ;;  %2069 = vmatprep.subr.bf16.mxu1 %v3413_v10  ;;  %v3447_v11 = vld [vmem:[#allocation47_spill] sm:$0xff] }
 0x2ac   : > { %1915 = vmatprep.subr.bf16.mxu0 %v3414_v12  ;;  %v3451_v12 = vld [vmem:[#allocation48_spill] sm:$0xff] }
 0x2ae   : > { %2070 = vmatpush3.bf16.msra.mxu1 %v3413_v10  ;;  %v3450_v10 = vld [vmem:[#allocation50_spill] sm:$0xff] }
 0x2af   : > { %1916 = vmatpush3.bf16.msra.mxu0 %v3415_v14  ;;  %2071 = vmatprep.subr.bf16.mxu1 %v3416_v17  ;;  %v3452_v14 = vld [vmem:[#allocation49_spill] sm:$0xff] }
 0x2b0   : > { %1917 = vmatprep.subr.bf16.mxu0 %v3417_v19  ;;  %v3454_v19 = vld [vmem:[#allocation51_spill] sm:$0xff] }
 0x2b2   : > { %2072 = vmatpush3.bf16.msra.mxu1 %v3416_v17  ;;  %v3453_v17 = vld [vmem:[#allocation53_spill] sm:$0xff] }
 0x2b3   : > { %1918 = vmatpush3.bf16.msra.mxu0 %v3418_v24  ;;  %2073 = vmatprep.subr.bf16.mxu1 %v3419_v33  ;;  %v3455_v24 = vld [vmem:[#allocation52_spill] sm:$0xff] }
 0x2b4   : > { %1919 = vmatprep.subr.bf16.mxu0 %v3420_v41  ;;  %v3457_v41 = vld [vmem:[#allocation54_spill] sm:$0xff] }
 0x2b6   : > { %2074 = vmatpush3.bf16.msra.mxu1 %v3419_v33  ;;  %v3456_v33 = vld [vmem:[#allocation55_spill] sm:$0xff] }
 0x2b7   : > { %1920 = vmatpush3.bf16.msra.mxu0 %v3421_v47  ;;  %2075 = vmatprep.subr.bf16.mxu1 %v3422_v45  ;;  %v3458_v47 = vld [vmem:[#allocation56_spill] sm:$0xff] }
 0x2b8   : > { %1921 = vmatprep.subr.bf16.mxu0 %v3423_v46 }
 0x2ba   : > { %2076 = vmatpush3.bf16.msra.mxu1 %v3422_v45 }
 0x2bb   : > { %1922 = vmatpush3.bf16.msra.mxu0 %v3424_v29  ;;  %2077 = vmatprep.subr.bf16.mxu1 %v3425_v26 }
 0x2bc   : > { %1346 = vmatprep.subr.bf16.mxu0 %v3439_v1 }
 0x2be   : > { %1257 = vmatmul.mubr.bf16.vlgmr.msra.gmra.mrb[32].mxu0 %v3054_v7  ;;  %2078 = vmatpush3.bf16.msra.mxu1 %v3425_v26 }
 0x2bf   : > { %1264 = vmatprep.mubr.bf16.mxu0 %v1094_v60  ;;  %2079 = vmatprep.subr.bf16.mxu1 %v3426_v34 }
 0x2c0   : > { %1347 = vmatpush1.bf16.msra.mxu0 %v2902_v32 }
 0x2c1   : > { %1348 = vmatprep.subr.bf16.mxu0 %v2906_v48 }
 0x2c2   : > { %2080 = vmatpush3.bf16.msra.mxu1 %v3426_v34 }
 0x2c3   : > { %2085 = vmatprep.subr.bf16.mxu1 %v2913_v31 }
 0x2c4   : > { %1349 = vmatpush1.bf16.msra.mxu0 %v2909_v49 }
 0x2c5   : > { %1350 = vmatprep.subr.bf16.mxu0 %v2911_v50  ;;  %2082 = vmatmul.mubr.bf16.vlgmr.msra.gmra.mrb[8].mxu1 %v3072_v40 }
 0x2c6   : > { %1265 = vmatmul.mubr.bf16.gmra.mrb[36].mxu0 %v3070_v16  ;;  %2086 = vmatpush3.bf16.msra.mxu1 %v2913_v31 }
 0x2c7   : > { %1378 = vmatprep.mubr.bf16.mxu0 %v3440_v2  ;;  %2087 = vmatprep.subr.bf16.mxu1 %v3441_v3 }
 0x2c8   : > { %1351 = vmatpush1.bf16.msra.mxu0 %v3442_v4 }
 0x2c9   : > { %1352 = vmatprep.subr.bf16.mxu0 %v3443_v5 }
 0x2ca   : > { %2088 = vmatpush3.bf16.msra.mxu1 %v3441_v3 }
 0x2cb   : > { %2089 = vmatprep.subr.bf16.mxu1 %v3444_v6 }
 0x2cc   : > { %1353 = vmatpush1.bf16.msra.mxu0 %v3445_v8 }
 0x2cd   : > { %1354 = vmatprep.subr.bf16.mxu0 %v3446_v9 }
 0x2ce   : > { %2090 = vmatpush3.bf16.msra.mxu1 %v3444_v6 }
 0x2cf   : > { %2091 = vmatprep.subr.bf16.mxu1 %v3447_v11 }
 0x2d0   : > { %1355 = vmatpush1.bf16.msra.mxu0 %v3448_v44 }
 0x2d1   : > { %1356 = vmatprep.subr.bf16.mxu0 %v3449_v18 }
 0x2d2   : > { %2092 = vmatpush3.bf16.msra.mxu1 %v3447_v11 }
 0x2d3   : > { %2093 = vmatprep.subr.bf16.mxu1 %v3450_v10 }
 0x2d4   : > { %1357 = vmatpush1.bf16.msra.mxu0 %v3451_v12 }
 0x2d5   : > { %1358 = vmatprep.subr.bf16.mxu0 %v3452_v14 }
 0x2d6   : > { %2094 = vmatpush3.bf16.msra.mxu1 %v3450_v10 }
 0x2d7   : > { %2095 = vmatprep.subr.bf16.mxu1 %v3453_v17 }
 0x2d8   : > { %1359 = vmatpush1.bf16.msra.mxu0 %v3454_v19 }
 0x2d9   : > { %1360 = vmatprep.subr.bf16.mxu0 %v3455_v24 }
 0x2da   : > { %2096 = vmatpush3.bf16.msra.mxu1 %v3453_v17 }
 0x2db   : > { %2097 = vmatprep.subr.bf16.mxu1 %v3456_v33 }
 0x2dc   : > { %1361 = vmatpush1.bf16.msra.mxu0 %v3457_v41 }
 0x2dd   : > { %1448 = vmatprep.subr.bf16.mxu0 %v3439_v1 }
 0x2de   : > { %2098 = vmatpush3.bf16.msra.mxu1 %v3456_v33 }
 0x2df   : > { %2099 = vmatprep.subr.bf16.mxu1 %v3458_v47 }
 0x2e2   : > { %2100 = vmatpush3.bf16.msra.mxu1 %v3458_v47 }
 0x2e3   : > { %2105 = vmatprep.subr.bf16.mxu1 %v2913_v31 }
 0x371   : > { %v1885_v45 = vpop.f32.mrb[24].mxu0 }
 0x372   : > { %v1886_v46 = vpop.f32.mrb[25].mxu0 }
 0x373   : > { %v1887_v29 = vadd.f32 %v1886_v46, %v1885_v45  ;;  %v1888_v26 = vpop.f32.mrb[26].mxu0 }
 0x374   : > { %v1889_v34 = vpop.f32.mrb[27].mxu0 }
 0x375   : > { %v1890_v7 = vadd.f32 %v1889_v34, %v1888_v26 }
 0x379   : > { %v1891_v37 = vpop.f32.mrb[28].mxu0 }
 0x37a   : > { %v1892_v22 = vpop.f32.mrb[29].mxu0 }
 0x37b   : > { %v1893_v21 = vadd.f32 %v1892_v22, %v1891_v37  ;;  %v1894_v13 = vpop.f32.mrb[30].mxu0 }
 0x37c   : > { %v1895_v30 = vpop.f32.mrb[31].mxu0 }
 0x37d   : > { %v1896_v43 = vadd.f32 %v1895_v30, %v1894_v13 }
 0x391   : > { %v1923_v59 = vpop.f32.mrb[32].mxu0 }
 0x392   : > { %v1924_v28 = vpop.f32.mrb[33].mxu0 }
 0x393   : > { %v1925_v16 = vadd.f32 %v1924_v28, %v1923_v59  ;;  %v1926_v15 = vpop.f32.mrb[34].mxu0 }
 0x394   : > { %v1927_v40 = vpop.f32.mrb[35].mxu0 }
 0x395   : > { %v1928_v60 = vadd.f32 %v1927_v40, %v1926_v15  ;;  %v2135_v63 = vadd.f32 %v1925_v16, %v1887_v29 }
 0x397   : > { %v2139_v55 = vadd.f32 %v1928_v60, %v1890_v7 }
 0x398   : > { %v2083_v56 = vpop.f32.mrb[8].mxu1 }
 0x399   : > { %v1929_v51 = vpop.f32.mrb[36].mxu0  ;;  %v1307_v57 = vpop.f32.mrb[9].mxu1 }
 0x39a   : > { %v1930_v54 = vpop.f32.mrb[37].mxu0  ;;  %v2136_v38 = vadd.f32 %v2135_v63, %v1307_v57  ;;  %v2084_v62 = vpop.f32.mrb[10].mxu1 }
 0x39b   : > { %v1931_v52 = vadd.f32 %v1930_v54, %v1929_v51  ;;  %v1932_v61 = vpop.f32.mrb[38].mxu0  ;;  %v1310_v36 = vpop.f32.mrb[11].mxu1 }
 0x39c   : > { %v1933_v58 = vpop.f32.mrb[39].mxu0  ;;  %v1322_v20 = vmul.f32 0.020833334, %v2136_v38  ;;  %v2140_v23 = vadd.f32 %v2139_v55, %v1310_v36  ;;  %v2322_v38 = vld [vmem:[%s2703_s13 + $0x10] sm:$0xff]  ;;  %v2323_v36 = vld [vmem:[%s2703_s13 + $0x58] sm:$0xff] }
 0x39d   : > { %v2133_v39 = vadd.f32 %v1931_v52, %v1893_v21  ;;  %v1934_v35 = vadd.f32 %v1933_v58, %v1932_v61 }
 0x39e   : > { %v1326_v27 = vadd.f32 1e-05, %v1322_v20  ;;  %v1323_v25 = vmul.f32 0.020833334, %v2140_v23  ;;  %v2324_v23 = vld [vmem:[%s2703_s13 + $0x28] sm:$0xff] }
 0x39f   : > { %v2134_v0 = vadd.f32 %v2133_v39, %v2083_v56  ;;  %v2137_v42 = vadd.f32 %v1934_v35, %v1896_v43  ;;  %v2321_v56 = vld [vmem:[%s2703_s13 + $0x40] sm:$0xff] }
 0x3a0   : > { %v1327_v45 = vadd.f32 1e-05, %v1323_v25  ;;  %2309 = vrsqrt.f32 %v1326_v27  ;;  %v2325_v25 = vld [vmem:[%s2703_s13 + $0x30] sm:$0xff] }
 0x3a1   : > { %v1324_v53 = vmul.f32 0.020833334, %v2134_v0  ;;  %v2138_v1 = vadd.f32 %v2137_v42, %v2084_v62 }
 0x3a2   : > { %2311 = vrsqrt.f32 %v1327_v45 }
 0x3a3   : > { %v1328_v46 = vadd.f32 1e-05, %v1324_v53  ;;  %v1325_v29 = vmul.f32 0.020833334, %v2138_v1 }
 0x3a5   : > { %v1329_v26 = vadd.f32 1e-05, %v1325_v29  ;;  %2313 = vrsqrt.f32 %v1328_v46  ;;  %v2326_v46 = vld [vmem:[%s2703_s13 + $0x38] sm:$0xff] }
 0x3a7   : > { %2315 = vrsqrt.f32 %v1329_v26 }
 0x3aa   : > { %v2310_v34 = vpop.eup %2309 }
 0x3ac   : > { %v2312_v7 = vpop.eup %2311 }
 0x3ad   : > { %v1334_v37 = vpack.c.bf16 %v2312_v7, %v2310_v34 }
 0x3af   : > { %v2314_v22 = vpop.eup %2313  ;;  %v1337_v21 = vunpack.c.h.bf16 %v1334_v37  ;;  %v1336_v13 = vunpack.c.l.bf16 %v1334_v37 }
 0x3b1   : > { %v2316_v30 = vpop.eup %2315  ;;  %v1341_v43 = vsub.f32 %v2312_v7, %v1337_v21  ;;  %v1340_v28 = vsub.f32 %v2310_v34, %v1336_v13  ;;  %v2327_v7 = vld [vmem:[%s2703_s13 + $0x48] sm:$0xff]  ;;  %v2328_v13 = vld [vmem:[%s2703_s13 + $0x50] sm:$0xff] }
 0x3b2   : > { %v1335_v59 = vpack.c.bf16 %v2316_v30, %v2314_v22 }
 0x3b3   : > { %v1344_v16 = vpack.c.bf16 %v1341_v43, %v1340_v28 }
 0x3b4   : > { %v1338_v15 = vunpack.c.l.bf16 %v1335_v59  ;;  %v1339_v40 = vunpack.c.h.bf16 %v1335_v59 }
 0x3b5   : > { %1379 = vmatmul.mubr.bf16.vlgmr.msra.gmra.mrb[40].mxu0 %v1344_v16  ;;  %2101 = vmatprep.mubr.bf16.mxu1 %v1344_v16 }
 0x3b6   : > { %v1342_v60 = vsub.f32 %v2314_v22, %v1338_v15  ;;  %v1343_v63 = vsub.f32 %v2316_v30, %v1339_v40  ;;  %1449 = vmatpush1.bf16.msra.mxu0 %v2902_v32  ;;  %1388 = vmatprep.mubr.bf16.mxu0 %v3440_v2  ;;  %v1563_v32 = vlaneseq }
 0x3b7   : > { %1450 = vmatprep.subr.bf16.mxu0 %v2906_v48 }
 0x3b8   : > { %v1345_v55 = vpack.c.bf16 %v1343_v63, %v1342_v60  ;;  %v1564_v48 = vshrl.u32 %v1563_v32, 7 }
 0x3ba   : > { %2102 = vmatmul.mubr.bf16.vlgmr.msra.gmra.mrb[12].mxu1 %v1345_v55  ;;  %1451 = vmatpush1.bf16.msra.mxu0 %v2909_v49  ;;  %v1565_v49 = vsub.s32 0, %v1564_v48 }
 0x3bb   : > { %2106 = vmatpush3.bf16.msra.mxu1 %v2913_v31  ;;  %2121 = vmatprep.mubr.bf16.mxu1 %v1334_v37  ;;  %v1569_v31 = vsub.s32 1, %v1564_v48 }
 0x3bc   : > { %1452 = vmatprep.subr.bf16.mxu0 %v2911_v50  ;;  %2107 = vmatprep.subr.bf16.mxu1 %v3441_v3  ;;  %v261_v50 = vld [vmem:[%s3269_s1] sm:$0x7] }
 0x3bd   : > { %1389 = vmatmul.mubr.bf16.gmra.mrb[44].mxu0 %v1345_v55 }
 0x3be   : > { %1453 = vmatpush1.bf16.msra.mxu0 %v3442_v4  ;;  %1480 = vmatprep.mubr.bf16.mxu0 %v3440_v2  ;;  %v1573_v4 = vsub.s32 2, %v1564_v48 }
 0x3bf   : > { %2108 = vmatpush3.bf16.msra.mxu1 %v3441_v3  ;;  %1454 = vmatprep.subr.bf16.mxu0 %v3443_v5  ;;  %v1566_v3 = vrot.slane %v261_v50, %v1565_v49 }
 0x3c0   : > { %2109 = vmatprep.subr.bf16.mxu1 %v3444_v6 }
 0x3c2   : > { %1455 = vmatpush1.bf16.msra.mxu0 %v3445_v8  ;;  %v2317_v8 = vld [vmem:[%s2703_s13] sm:$0xff] }
 0x3c3   : > { %2110 = vmatpush3.bf16.msra.mxu1 %v3444_v6  ;;  %1456 = vmatprep.subr.bf16.mxu0 %v3446_v9  ;;  %v3183_v6 = vrot.slane %v261_v50, %v1569_v31 }
 0x3c4   : > { %2111 = vmatprep.subr.bf16.mxu1 %v3447_v11 }
 0x3c6   : > { %1457 = vmatpush1.bf16.msra.mxu0 %v3448_v44 }
 0x3c7   : > { %2112 = vmatpush3.bf16.msra.mxu1 %v3447_v11  ;;  %1458 = vmatprep.subr.bf16.mxu0 %v3449_v18  ;;  %v2318_v11 = vld [vmem:[%s2703_s13 + $0x8] sm:$0xff] }
 0x3c8   : > { %2113 = vmatprep.subr.bf16.mxu1 %v3450_v10 }
 0x3ca   : > { %1459 = vmatpush1.bf16.msra.mxu0 %v3451_v12  ;;  %v2319_v12 = vld [vmem:[%s2703_s13 + $0x18] sm:$0xff] }
 0x3cb   : > { %2114 = vmatpush3.bf16.msra.mxu1 %v3450_v10  ;;  %1460 = vmatprep.subr.bf16.mxu0 %v3452_v14 }
 0x3cc   : > { %2115 = vmatprep.subr.bf16.mxu1 %v3453_v17 }
 0x3ce   : > { %1461 = vmatpush1.bf16.msra.mxu0 %v3454_v19  ;;  %v1574_v19 = vrot.slane %v261_v50, %v1573_v4 }
 0x3cf   : > { %2116 = vmatpush3.bf16.msra.mxu1 %v3453_v17  ;;  %1462 = vmatprep.subr.bf16.mxu0 %v3455_v24 }
 0x3d0   : > { %2117 = vmatprep.subr.bf16.mxu1 %v3456_v33 }
 0x3d2   : > { %1463 = vmatpush1.bf16.msra.mxu0 %v3457_v41 }
 0x3d3   : > { %2118 = vmatpush3.bf16.msra.mxu1 %v3456_v33  ;;  %v2320_v33 = vld [vmem:[%s2703_s13 + $0x20] sm:$0xff] }
 0x3d4   : > { %2119 = vmatprep.subr.bf16.mxu1 %v3458_v47 }
 0x3d5   : > { %1481 = vmatmul.mubr.bf16.vlgmr.msra.gmra.mrb[40].mxu0 %v1334_v37 }
 0x3d6   : > { %1490 = vmatprep.mubr.bf16.mxu0 %v3440_v2 }
 0x3d7   : > { %2120 = vmatpush3.bf16.msra.mxu1 %v3458_v47 }
 0x3da   : > { %2122 = vmatmul.mubr.bf16.vlgmr.msra.gmra.mrb[12].mxu1 %v1335_v59 }
 0x3dd   : > { %1491 = vmatmul.mubr.bf16.gmra.mrb[44].mxu0 %v1335_v59 }
 0x4a8   : > { %v1482_v5 = vpop.f32.mrb[40].mxu0 }
 0x4a9   : > { %v1550_v2 = vmul.f32 %v2317_v8, %v1482_v5  ;;  %v1484_v9 = vpop.f32.mrb[41].mxu0 }
 0x4aa   : > { %v1551_v44 = vmul.f32 %v2318_v11, %v1484_v9  ;;  %v1486_v18 = vpop.f32.mrb[42].mxu0 }
 0x4ab   : > { %v1578_v10 = vmul.f32 %v1566_v3, %v1550_v2  ;;  %v1553_v14 = vmul.f32 %v2319_v12, %v1486_v18  ;;  %v1488_v17 = vpop.f32.mrb[43].mxu0 }
 0x4ac   : > { %v1579_v24 = vmul.f32 %v3183_v6, %v1551_v44  ;;  %v1554_v41 = vmul.f32 %v2320_v33, %v1488_v17 }
 0x4ad   : > { %v2123_v47 = vpop.f32.mrb[12].mxu1  ;;  %1590 = vst [vmem:[%s3192_s27] sm:$0xff] %v1578_v10  ;;  %v1581_v51 = vmul.f32 %v1566_v3, %v1553_v14 }
 0x4ae   : > { %v1558_v54 = vmul.f32 %v2321_v56, %v2123_v47  ;;  %v1535_v57 = vpop.f32.mrb[13].mxu1  ;;  %1591 = vst [vmem:[%s3192_s27 + $0x8] sm:$0xff] %v1579_v24  ;;  %v1582_v52 = vmul.f32 %v3183_v6, %v1554_v41 }
 0x4af   : > { %v1552_v61 = vmul.f32 %v2322_v38, %v1535_v57  ;;  %v2124_v62 = vpop.f32.mrb[14].mxu1  ;;  %1593 = vst [vmem:[%s3192_s27 + $0x18] sm:$0xff] %v1581_v51 }
 0x4b0   : > { %v1586_v58 = vmul.f32 %v1574_v19, %v1558_v54  ;;  %v1561_v39 = vmul.f32 %v2323_v36, %v2124_v62  ;;  %v1538_v20 = vpop.f32.mrb[15].mxu1  ;;  %1594 = vst [vmem:[%s3192_s27 + $0x20] sm:$0xff] %v1582_v52  ;;  %v1492_v27 = vpop.f32.mrb[44].mxu0 }
 0x4b1   : > { %v1580_v35 = vmul.f32 %v1574_v19, %v1552_v61  ;;  %v1555_v0 = vmul.f32 %v2324_v23, %v1538_v20  ;;  %v1556_v53 = vmul.f32 %v2325_v25, %v1492_v27  ;;  %v1494_v1 = vpop.f32.mrb[45].mxu0 }
 0x4b2   : > { %1598 = vst [vmem:[%s3192_s27 + $0x40] sm:$0xff] %v1586_v58  ;;  %v1589_v42 = vmul.f32 %v1574_v19, %v1561_v39  ;;  %v1557_v29 = vmul.f32 %v2326_v46, %v1494_v1  ;;  %v1496_v26 = vpop.f32.mrb[46].mxu0 }
 0x4b3   : > { %1592 = vst [vmem:[%s3192_s27 + $0x10] sm:$0xff] %v1580_v35  ;;  %v1583_v45 = vmul.f32 %v1574_v19, %v1555_v0  ;;  %v1584_v34 = vmul.f32 %v1566_v3, %v1556_v53  ;;  %v1559_v37 = vmul.f32 %v2327_v7, %v1496_v26  ;;  %v1498_v22 = vpop.f32.mrb[47].mxu0 }
 0x4b4   : > { %1601 = vst [vmem:[%s3192_s27 + $0x58] sm:$0xff] %v1589_v42  ;;  %v1585_v21 = vmul.f32 %v3183_v6, %v1557_v29  ;;  %v1560_v30 = vmul.f32 %v2328_v13, %v1498_v22 }
 0x4b5   : > { %1595 = vst [vmem:[%s3192_s27 + $0x28] sm:$0xff] %v1583_v45  ;;  %1596 = vst [vmem:[%s3192_s27 + $0x30] sm:$0xff] %v1584_v34  ;;  %v1587_v59 = vmul.f32 %v1566_v3, %v1559_v37 }
 0x4b6   : > { %1597 = vst [vmem:[%s3192_s27 + $0x38] sm:$0xff] %v1585_v21  ;;  %v1588_v43 = vmul.f32 %v3183_v6, %v1560_v30 }
 0x4b7   : > { %1599 = vst [vmem:[%s3192_s27 + $0x48] sm:$0xff] %v1587_v59 }
 0x4b8   : > { %1600 = vst [vmem:[%s3192_s27 + $0x50] sm:$0xff] %v1588_v43 }
 0x4b9   : > { %2428 = shalt.err (!%p2425_p2)
}
 0x4ba   : > { %s2429_s8 = scalar_lea.hbm %s3218_s28, 1536  ;;  %s2433_s13 = scalar_lea.hbm %s3272_s4, 3072 }
 0x4bb   : > { %p2430_p13 = scmp.ne.s32.totalorder %s3218_s28, %s2429_s8  ;;  %p2434_p4 = scmp.lt.u32.totalorder %s3218_s28, %s3272_s4 }
 0x4bc   : > { %p2435_p7 = scmp.lt.u32.totalorder %s2433_s13, %s2429_s8  ;;  %p2437_p11 = scmp.lt.u32.totalorder %s2429_s8, %s3218_s28 }
 0x4bd   : > { %p2431_p6 = pnand %p2430_p13, %p3459_p0 }
 0x4be   : > { %p2436_p8 = por %p2435_p7, %p2434_p4 }
 0x4bf   : > { %p2432_p10 = pneg %p2431_p6 }
 0x4c0   : > { %p2438_p1 = por %p2437_p11, %p2436_p8 }
 0x4c2   : > { %p2439_p3 = pnand %p2438_p1, %p2432_p10 }
 0x4c4   : > { %2442 = shalt.err (!%p2439_p3)
}
 0x4c5   : > { %s2498_s27 = smov 384   ;;  %s2499_s5 = smov 24  }
 0x4c6   : > { %2187 = dma.vmem_to_hbm [thread:$0]  (%p3459_p0), %s3220_s25, 1536, %s3218_s28, %s1603_s26, %s2498_s27, %s2498_s27, %s2499_s5  }
 0x4c7 PF: > { %s1632_s19 = sand.u32 1, %s2473_s15   ;;  %p3460_p5 = scmp.ne.s32.totalorder %s3358_s22, 0 }
 0x4c8   : > { %p3461_p9 = scmp.ge.s32.totalorder %s2485_s18, 2  ;;  %s1633_s7 = scalar_lea.sflag [#allocation4], %s1632_s19 }
 0x4ca   : > { %p2201_p12 = pnand %p3461_p9, %p3460_p5 }
 0x4cc   : > { %2468 = dma.done.wait (!%p2201_p12), %s1633_s7, 1536  }
 0x4cd   : > { %2470 = vsyncadd (!%p2201_p12), %s1633_s7, 4294965760  ;;  %p18_p2 = scmp.ge.s32.totalorder %s2635_s11, 4   ;;  %s3462_s15 = smov %s2477_s16 }
 0x4ce   : > { %s3463_s16 = smov %s2481_s17  ;;  %s3464_s17 = smov %s2644_s14 }
 0x4cf   : > { %s3465_s18 = smov %s2635_s11  ;;  %20 = sbr.rel (!%p18_p2) target bundleno = 6 (0x6), region = 89 }
 0x4d6   :  { %1638 = vsyncpa [#allocation3], 1 }
 0x4d7   :  { %1640 = vsyncpa [#allocation3 + $0x1], 1 }
 0x4d8   :  { %1641 = vsyncpa [#allocation6], 1 }
 0x4d9   :  { %1642 = vsyncpa [#allocation4], 1 }
 0x4da   :  { %1644 = vsyncpa [#allocation4 + $0x1], 1 }

</bundles_post_ra>
